<compile_context>
chip_gen: v7x
topology: tpu7x:2x2x1
jax: 0.10.0
libtpu: 0.0.40
codegen_flags: <defaults>
</compile_context>

<pallas_src>
import jax
import jax.numpy as jnp
from jax import lax
from jax.experimental import pallas as pl
from jax.experimental.pallas import tpu as pltpu


def _round_up(x, m):
    return ((x + m - 1) // m) * m


# ----------------------------------------------------------------------------
# One-time parameter preparation (hoisted out of the per-call hot path)
# ----------------------------------------------------------------------------
def prepare_params(p):
    f32 = jnp.float32
    H = p["whf"].shape[0]
    wx = jnp.concatenate([p["wif"], p["wib"]], axis=1).astype(f32)     # (A, 8H)
    bx = jnp.concatenate([p["bf"], p["bb"]], axis=1).astype(f32)       # (1, 8H)
    # block-diagonal recurrent weight: [[whf, 0], [0, whb]]  -> (2H, 8H)
    z = jnp.zeros((H, 4 * H), f32)
    whbd = jnp.concatenate(
        [jnp.concatenate([p["whf"].astype(f32), z], axis=1),
         jnp.concatenate([z, p["whb"].astype(f32)], axis=1)], axis=0)
    wfh = jnp.concatenate([p["wof"], p["wcpf"]], axis=1).astype(f32)   # (H, O+1)
    wbh = jnp.concatenate([p["wob"], p["wcpb"]], axis=1).astype(f32)   # (H, O+1)
    bh = jnp.concatenate([p["bo"], p["bcp"]], axis=1).astype(f32)      # (1, O+1)
    return {"w1": p["w1"].astype(f32), "b1": p["b1"].astype(f32),
            "wx": wx, "bx": bx, "whbd": whbd,
            "wfh": wfh, "wbh": wbh, "bh": bh}


# ----------------------------------------------------------------------------
# Kernel
# ----------------------------------------------------------------------------
def _make_kernel(T, Bt, WIN, A, H, O):
    O1 = O + 1
    G = 4 * H  # gate width per direction (one 128-lane vreg at H=32)

    def kernel(x_ref, mask_ref, w1_ref, b1_ref, wx_ref, bx_ref, whbd_ref,
               wfh_ref, wbh_ref, bh_ref,
               out_ref,
               xg_ref, hf_ref, hb_ref):
        f32 = jnp.float32

        # ---- stage 1: time-parallel matmuls ---------------------------------
        # aux MLP + both LSTM input projections as two (T*Bt, .) matmuls;
        # the fused x-gate precompute is stored once, 2D, no per-direction
        # split (fwd gates live in lanes [0:4H), bwd in [4H:8H)).
        xw = x_ref[...].reshape(T * Bt, WIN)
        aux = jnp.maximum(
            jnp.dot(xw, w1_ref[...], preferred_element_type=f32) + b1_ref[...],
            0.0)
        xg_ref[...] = (jnp.dot(aux, wx_ref[...], preferred_element_type=f32)
                       + bx_ref[...])

        # ---- stage 2: fused fwd/bwd recurrence ------------------------------
        whbd = whbd_ref[...]          # hoisted: (2H, 8H) block-diag, loaded once

        def cell(gates, c):
            # full-width activations (4H = one vreg at H=32), then static
            # per-gate slices (i, f, g, o).  For larger H, reorder the fused
            # gate layout so sigmoid/tanh only touch the lanes they need.
            sig = jax.nn.sigmoid(gates)
            th = jnp.tanh(gates)
            i = sig[:, 0 * H:1 * H]
            f = sig[:, 1 * H:2 * H]
            g = th[:, 2 * H:3 * H]
            o = sig[:, 3 * H:4 * H]
            c_new = f * c + i * g
            return o * jnp.tanh(c_new), c_new

        hf = jnp.zeros((Bt, H), f32)
        cf = jnp.zeros((Bt, H), f32)
        hb = jnp.zeros((Bt, H), f32)
        cb = jnp.zeros((Bt, H), f32)
        # T is a small static constant -> full unroll; static ref offsets and
        # the single block-diagonal dot per step keep the serial chain short.
        for t in range(T):
            s = T - 1 - t
            hcat = jnp.concatenate([hf, hb], axis=1)                # (Bt, 2H)
            gcat = jnp.dot(hcat, whbd, preferred_element_type=f32)  # (Bt, 8H)
            gf = xg_ref[pl.ds(t * Bt, Bt), pl.ds(0, G)] + gcat[:, 0:G]
            gb = xg_ref[pl.ds(s * Bt, Bt), pl.ds(G, G)] + gcat[:, G:2 * G]
            hf, cf = cell(gf, cf)
            hb, cb = cell(gb, cb)
            hf_ref[pl.ds(t * Bt, Bt), :] = hf
            hb_ref[pl.ds(s * Bt, Bt), :] = hb

        # ---- stage 3: fused heads over all timesteps ------------------------
        out = (jnp.dot(hf_ref[...], wfh_ref[...], preferred_element_type=f32)
               + jnp.dot(hb_ref[...], wbh_ref[...], preferred_element_type=f32)
               + bh_ref[...])                                  # (T*Bt, O+1)

        # square_normalize (geography) + mask on coord columns only; the
        # changepoint logit column passes through untouched.
        coord = out[:, :O]
        ss = jnp.sum(coord * coord, axis=-1, keepdims=True)
        m2 = mask_ref[...].reshape(T * Bt, 1)
        coord = coord * (lax.rsqrt(ss + 1e-12) * m2)
        fused = jnp.concatenate([coord, out[:, O:]], axis=-1)
        out_ref[...] = fused.reshape(T, Bt, O1).astype(out_ref.dtype)

    return kernel


# ----------------------------------------------------------------------------
# Wrapper (hot path: layout glue + pallas_call only)
# ----------------------------------------------------------------------------
def model_b_forward(x, mask, pp, *, b_tile=None):
    """x: (B, n_win, win_size) f32, mask: (B, n_win, 1) -> (coord, cp)."""
    B, T, WIN = x.shape
    A = pp["w1"].shape[1]
    H = pp["wx"].shape[1] // 8
    O1 = pp["wfh"].shape[1]
    O = O1 - 1

    # Batch tile: as large as possible, but split into >=2 grid blocks when
    # the padded batch allows so the 'parallel' axis engages both v7x cores.
    Bp8 = _round_up(B, 8)
    if b_tile is None:
        b_tile = max(8, min(256, _round_up(-(-Bp8 // 2), 8)))
    Bp = _round_up(B, b_tile)

    # glue: time-major layout + pad batch (sublane dim) to the tile size
    x_t = jnp.transpose(x, (1, 0, 2)).astype(jnp.float32)
    m_t = jnp.transpose(mask, (1, 0, 2)).astype(jnp.float32)
    if Bp != B:
        x_t = jnp.pad(x_t, ((0, 0), (0, Bp - B), (0, 0)))
        m_t = jnp.pad(m_t, ((0, 0), (0, Bp - B), (0, 0)))

    out = pl.pallas_call(
        _make_kernel(T, b_tile, WIN, A, H, O),
        grid=(Bp // b_tile,),
        in_specs=[
            pl.BlockSpec((T, b_tile, WIN), lambda b: (0, b, 0)),
            pl.BlockSpec((T, b_tile, 1), lambda b: (0, b, 0)),
            pl.BlockSpec((WIN, A), lambda b: (0, 0)),
            pl.BlockSpec((1, A), lambda b: (0, 0)),
            pl.BlockSpec((A, 8 * H), lambda b: (0, 0)),
            pl.BlockSpec((1, 8 * H), lambda b: (0, 0)),
            pl.BlockSpec((2 * H, 8 * H), lambda b: (0, 0)),
            pl.BlockSpec((H, O1), lambda b: (0, 0)),
            pl.BlockSpec((H, O1), lambda b: (0, 0)),
            pl.BlockSpec((1, O1), lambda b: (0, 0)),
        ],
        out_specs=pl.BlockSpec((T, b_tile, O1), lambda b: (0, b, 0)),
        out_shape=jax.ShapeDtypeStruct((T, Bp, O1), jnp.float32),
        scratch_shapes=[
            pltpu.VMEM((T * b_tile, 8 * H), jnp.float32),  # fused x-gate precompute
            pltpu.VMEM((T * b_tile, H), jnp.float32),      # fwd hidden states
            pltpu.VMEM((T * b_tile, H), jnp.float32),      # bwd hidden states
        ],
        compiler_params=pltpu.CompilerParams(
            dimension_semantics=("parallel",)),
    )(x_t, m_t, pp["w1"], pp["b1"], pp["wx"], pp["bx"], pp["whbd"],
      pp["wfh"], pp["wbh"], pp["bh"])

    coord_main = jnp.transpose(out[:, :B, :O], (1, 0, 2))   # (B, T, O)
    cp_logits = jnp.transpose(out[:, :B, O:], (1, 0, 2))    # (B, T, 1)
    return coord_main, cp_logits


# ----------------------------------------------------------------------------
# Plain-JAX reference (for a correctness self-check)
# ----------------------------------------------------------------------------
def reference_forward(x, mask, p):
    H = p["whf"].shape[0]
    a = jnp.maximum(jnp.einsum("btw,wa->bta", x, p["w1"]) + p["b1"][0], 0.0)
    a_tm = jnp.transpose(a, (1, 0, 2))
    B = x.shape[0]
    h0 = jnp.zeros((B, H), jnp.float32)
    c0 = jnp.zeros((B, H), jnp.float32)

    def make_step(wih, whh, b):
        def step(carry, a_t):
            h, c = carry
            gates = a_t @ wih + h @ whh + b[0]
            i = jax.nn.sigmoid(gates[:, :H])
            f = jax.nn.sigmoid(gates[:, H:2 * H])
            g = jnp.tanh(gates[:, 2 * H:3 * H])
            o = jax.nn.sigmoid(gates[:, 3 * H:])
            c = f * c + i * g
            h = o * jnp.tanh(c)
            return (h, c), h
        return step

    _, hf = lax.scan(make_step(p["wif"], p["whf"], p["bf"]), (h0, c0), a_tm)
    _, hb_rev = lax.scan(make_step(p["wib"], p["whb"], p["bb"]), (h0, c0),
                         a_tm[::-1])
    hb = hb_rev[::-1]

    o = (jnp.einsum("tbh,ho->tbo", hf, p["wof"])
         + jnp.einsum("tbh,ho->tbo", hb, p["wob"]) + p["bo"][0])
    o = o / jnp.sqrt(jnp.sum(o * o, axis=-1, keepdims=True))
    coord = jnp.transpose(o, (1, 0, 2)) * mask
    cp = (jnp.einsum("tbh,ho->tbo", hf, p["wcpf"])
          + jnp.einsum("tbh,ho->tbo", hb, p["wcpb"]) + p["bcp"][0])
    cp = jnp.transpose(cp, (1, 0, 2))
    return coord, cp


# ----------------------------------------------------------------------------
# Main
# ----------------------------------------------------------------------------
if __name__ == "__main__":
    # Small, module-consistent config
    B, T, WIN = 2, 8, 32          # batch, n_win, per-window features
    A, H, O = 32, 32, 3           # aux_net_hidden, rnn_net_hidden, rnn_net_out

    key = jax.random.PRNGKey(0)
    ks = jax.random.split(key, 16)
    s = 0.1
    params = {
        "w1":  s * jax.random.normal(ks[0], (WIN, A), jnp.float32),
        "b1":  s * jax.random.normal(ks[1], (1, A), jnp.float32),
        "wif": s * jax.random.normal(ks[2], (A, 4 * H), jnp.float32),
        "whf": s * jax.random.normal(ks[3], (H, 4 * H), jnp.float32),
        "bf":  s * jax.random.normal(ks[4], (1, 4 * H), jnp.float32),
        "wib": s * jax.random.normal(ks[5], (A, 4 * H), jnp.float32),
        "whb": s * jax.random.normal(ks[6], (H, 4 * H), jnp.float32),
        "bb":  s * jax.random.normal(ks[7], (1, 4 * H), jnp.float32),
        "wof": s * jax.random.normal(ks[8], (H, O), jnp.float32),
        "wob": s * jax.random.normal(ks[9], (H, O), jnp.float32),
        "bo":  s * jax.random.normal(ks[10], (1, O), jnp.float32),
        "wcpf": s * jax.random.normal(ks[11], (H, 1), jnp.float32),
        "wcpb": s * jax.random.normal(ks[12], (H, 1), jnp.float32),
        "bcp": s * jax.random.normal(ks[13], (1, 1), jnp.float32),
    }

    x = jax.random.normal(ks[14], (B, T, WIN), jnp.float32)
    # mask in the torch module is uint8 (0/1); multiply happens in float.
    mask = (jax.random.uniform(ks[15], (B, T, 1)) > 0.2).astype(jnp.float32)

    # one-time weight fusion / casts (hoisted off the per-call hot path)
    pp = jax.tree_util.tree_map(jnp.asarray, prepare_params(params))
    jax.block_until_ready(pp)

    fwd = jax.jit(model_b_forward)
    coord_main, cp_logits = fwd(x, mask, pp)
    jax.block_until_ready((coord_main, cp_logits))

    ref_coord, ref_cp = reference_forward(x, mask, params)
    assert coord_main.shape == (B, T, O) and cp_logits.shape == (B, T, 1)
    assert jnp.allclose(coord_main, ref_coord, rtol=1e-3, atol=1e-3)
    assert jnp.allclose(cp_logits, ref_cp, rtol=1e-3, atol=1e-3)

    print("KERNEL_OK")
</pallas_src>

<mosaic_0001>
module attributes {stable_mosaic.version = 11 : i64} {
  func.func @kernel(%arg0: i32, %arg1: memref<8x8x32xf32, #tpu.memory_space<vmem>>, %arg2: memref<8x8x1xf32, #tpu.memory_space<vmem>>, %arg3: memref<32x32xf32, #tpu.memory_space<vmem>>, %arg4: memref<1x32xf32, #tpu.memory_space<vmem>>, %arg5: memref<32x256xf32, #tpu.memory_space<vmem>>, %arg6: memref<1x256xf32, #tpu.memory_space<vmem>>, %arg7: memref<64x256xf32, #tpu.memory_space<vmem>>, %arg8: memref<32x4xf32, #tpu.memory_space<vmem>>, %arg9: memref<32x4xf32, #tpu.memory_space<vmem>>, %arg10: memref<1x4xf32, #tpu.memory_space<vmem>>, %arg11: memref<8x8x4xf32, #tpu.memory_space<vmem>>, %arg12: memref<64x256xf32, #tpu.memory_space<vmem>>, %arg13: memref<64x32xf32, #tpu.memory_space<vmem>>, %arg14: memref<64x32xf32, #tpu.memory_space<vmem>>) attributes {dimension_semantics = [#tpu.dimension_semantics<parallel>], iteration_bounds = array<i64: 1>, scalar_prefetch = 0 : i64, scratch_operands = 3 : i64, tpu.core_type = #tpu.core_type<tc>, window_params = [{transform_indices = @transform_0, window_bounds = array<i64: 8, 8, 32>}, {transform_indices = @transform_1, window_bounds = array<i64: 8, 8, 1>}, {pipeline_mode = #tpu.pipeline_mode<synchronous>, transform_indices = @transform_2, window_bounds = array<i64: 32, 32>}, {pipeline_mode = #tpu.pipeline_mode<synchronous>, transform_indices = @transform_3, window_bounds = array<i64: 1, 32>}, {pipeline_mode = #tpu.pipeline_mode<synchronous>, transform_indices = @transform_4, window_bounds = array<i64: 32, 256>}, {pipeline_mode = #tpu.pipeline_mode<synchronous>, transform_indices = @transform_5, window_bounds = array<i64: 1, 256>}, {pipeline_mode = #tpu.pipeline_mode<synchronous>, transform_indices = @transform_6, window_bounds = array<i64: 64, 256>}, {pipeline_mode = #tpu.pipeline_mode<synchronous>, transform_indices = @transform_7, window_bounds = array<i64: 32, 4>}, {pipeline_mode = #tpu.pipeline_mode<synchronous>, transform_indices = @transform_8, window_bounds = array<i64: 32, 4>}, {pipeline_mode = #tpu.pipeline_mode<synchronous>, transform_indices = @transform_9, window_bounds = array<i64: 1, 4>}, {transform_indices = @transform_10, window_bounds = array<i64: 8, 8, 4>}]} {
    %c0 = arith.constant 0 : index
    %c0_0 = arith.constant 0 : index
    %c0_1 = arith.constant 0 : index
    %0 = vector.load %arg1[%c0, %c0_0, %c0_1] : memref<8x8x32xf32, #tpu.memory_space<vmem>>, vector<8x8x32xf32>
    %1 = vector.shape_cast %0 : vector<8x8x32xf32> to vector<64x32xf32>
    %c0_2 = arith.constant 0 : index
    %c0_3 = arith.constant 0 : index
    %2 = vector.load %arg3[%c0_2, %c0_3] : memref<32x32xf32, #tpu.memory_space<vmem>>, vector<32x32xf32>
    %cst = arith.constant dense<0.000000e+00> : vector<64x32xf32>
    %3 = tpu.matmul %1, %2, %cst {dimension_numbers = #tpu.dot_dimension_numbers<[1], [0], [0], [1], [0, 0, 1, 1], [], []>} : vector<64x32xf32>, vector<32x32xf32>, vector<64x32xf32> -> vector<64x32xf32>
    %c0_4 = arith.constant 0 : index
    %c0_5 = arith.constant 0 : index
    %4 = vector.load %arg4[%c0_4, %c0_5] : memref<1x32xf32, #tpu.memory_space<vmem>>, vector<1x32xf32>
    %5 = vector.broadcast %4 : vector<1x32xf32> to vector<64x32xf32>
    %6 = arith.addf %3, %5 : vector<64x32xf32>
    %cst_6 = arith.constant 0.000000e+00 : f32
    %7 = vector.broadcast %cst_6 : f32 to vector<64x32xf32>
    %8 = arith.maximumf %6, %7 : vector<64x32xf32>
    %c0_7 = arith.constant 0 : index
    %c0_8 = arith.constant 0 : index
    %9 = vector.load %arg5[%c0_7, %c0_8] : memref<32x256xf32, #tpu.memory_space<vmem>>, vector<32x256xf32>
    %cst_9 = arith.constant dense<0.000000e+00> : vector<64x256xf32>
    %10 = tpu.matmul %8, %9, %cst_9 {dimension_numbers = #tpu.dot_dimension_numbers<[1], [0], [0], [1], [0, 0, 1, 1], [], []>} : vector<64x32xf32>, vector<32x256xf32>, vector<64x256xf32> -> vector<64x256xf32>
    %c0_10 = arith.constant 0 : index
    %c0_11 = arith.constant 0 : index
    %11 = vector.load %arg6[%c0_10, %c0_11] : memref<1x256xf32, #tpu.memory_space<vmem>>, vector<1x256xf32>
    %12 = vector.broadcast %11 : vector<1x256xf32> to vector<64x256xf32>
    %13 = arith.addf %10, %12 : vector<64x256xf32>
    %c0_12 = arith.constant 0 : index
    %c0_13 = arith.constant 0 : index
    %14 = vector.load %arg12[%c0_12, %c0_13] : memref<64x256xf32, #tpu.memory_space<vmem>>, vector<64x256xf32>
    tpu.vector_store %arg12[%c0_12, %c0_13], %13 {strides = array<i32>} : memref<64x256xf32, #tpu.memory_space<vmem>>, vector<64x256xf32>,
    %c0_14 = arith.constant 0 : index
    %c0_15 = arith.constant 0 : index
    %15 = vector.load %arg7[%c0_14, %c0_15] : memref<64x256xf32, #tpu.memory_space<vmem>>, vector<64x256xf32>
    %cst_16 = arith.constant 0.000000e+00 : f32
    %16 = vector.broadcast %cst_16 : f32 to vector<8x32xf32>
    %cst_17 = arith.constant 0.000000e+00 : f32
    %17 = vector.broadcast %cst_17 : f32 to vector<8x32xf32>
    %cst_18 = arith.constant 0.000000e+00 : f32
    %18 = vector.broadcast %cst_18 : f32 to vector<8x32xf32>
    %cst_19 = arith.constant 0.000000e+00 : f32
    %19 = vector.broadcast %cst_19 : f32 to vector<8x32xf32>
    %20 = tpu.concatenate %16, %18 in 1 : vector<8x32xf32>, vector<8x32xf32> -> vector<8x64xf32>
    %cst_20 = arith.constant dense<0.000000e+00> : vector<8x256xf32>
    %21 = tpu.matmul %20, %15, %cst_20 {dimension_numbers = #tpu.dot_dimension_numbers<[1], [0], [0], [1], [0, 0, 1, 1], [], []>} : vector<8x64xf32>, vector<64x256xf32>, vector<8x256xf32> -> vector<8x256xf32>
    %c0_21 = arith.constant 0 : index
    %c0_22 = arith.constant 0 : index
    %22 = vector.load %arg12[%c0_21, %c0_22] : memref<64x256xf32, #tpu.memory_space<vmem>>, vector<8x128xf32>
    %23 = vector.extract_strided_slice %21 {offsets = [0, 0], sizes = [8, 128], strides = [1, 1]} : vector<8x256xf32> to vector<8x128xf32>
    %24 = arith.addf %22, %23 : vector<8x128xf32>
    %c56 = arith.constant 56 : index
    %c128 = arith.constant 128 : index
    %25 = vector.load %arg12[%c56, %c128] : memref<64x256xf32, #tpu.memory_space<vmem>>, vector<8x128xf32>
    %26 = vector.extract_strided_slice %21 {offsets = [0, 128], sizes = [8, 128], strides = [1, 1]} : vector<8x256xf32> to vector<8x128xf32>
    %27 = arith.addf %25, %26 : vector<8x128xf32>
    %28 = arith.negf %24 : vector<8x128xf32>
    %29 = math.exp %28 : vector<8x128xf32>
    %cst_23 = arith.constant 1.000000e+00 : f32
    %30 = vector.broadcast %cst_23 : f32 to vector<8x128xf32>
    %31 = arith.addf %30, %29 : vector<8x128xf32>
    %32 = arith.divf %30, %31 : vector<8x128xf32>
    %33 = math.tanh %24 : vector<8x128xf32>
    %34 = vector.extract_strided_slice %32 {offsets = [0, 0], sizes = [8, 32], strides = [1, 1]} : vector<8x128xf32> to vector<8x32xf32>
    %35 = vector.extract_strided_slice %32 {offsets = [0, 32], sizes = [8, 32], strides = [1, 1]} : vector<8x128xf32> to vector<8x32xf32>
    %36 = vector.extract_strided_slice %33 {offsets = [0, 64], sizes = [8, 32], strides = [1, 1]} : vector<8x128xf32> to vector<8x32xf32>
    %37 = vector.extract_strided_slice %32 {offsets = [0, 96], sizes = [8, 32], strides = [1, 1]} : vector<8x128xf32> to vector<8x32xf32>
    %38 = arith.mulf %35, %17 : vector<8x32xf32>
    %39 = arith.mulf %34, %36 : vector<8x32xf32>
    %40 = arith.addf %38, %39 : vector<8x32xf32>
    %41 = math.tanh %40 : vector<8x32xf32>
    %42 = arith.mulf %37, %41 : vector<8x32xf32>
    %43 = arith.negf %27 : vector<8x128xf32>
    %44 = math.exp %43 : vector<8x128xf32>
    %cst_24 = arith.constant 1.000000e+00 : f32
    %45 = vector.broadcast %cst_24 : f32 to vector<8x128xf32>
    %46 = arith.addf %45, %44 : vector<8x128xf32>
    %47 = arith.divf %45, %46 : vector<8x128xf32>
    %48 = math.tanh %27 : vector<8x128xf32>
    %49 = vector.extract_strided_slice %47 {offsets = [0, 0], sizes = [8, 32], strides = [1, 1]} : vector<8x128xf32> to vector<8x32xf32>
    %50 = vector.extract_strided_slice %47 {offsets = [0, 32], sizes = [8, 32], strides = [1, 1]} : vector<8x128xf32> to vector<8x32xf32>
    %51 = vector.extract_strided_slice %48 {offsets = [0, 64], sizes = [8, 32], strides = [1, 1]} : vector<8x128xf32> to vector<8x32xf32>
    %52 = vector.extract_strided_slice %47 {offsets = [0, 96], sizes = [8, 32], strides = [1, 1]} : vector<8x128xf32> to vector<8x32xf32>
    %53 = arith.mulf %50, %19 : vector<8x32xf32>
    %54 = arith.mulf %49, %51 : vector<8x32xf32>
    %55 = arith.addf %53, %54 : vector<8x32xf32>
    %56 = math.tanh %55 : vector<8x32xf32>
    %57 = arith.mulf %52, %56 : vector<8x32xf32>
    %c0_25 = arith.constant 0 : index
    %c0_26 = arith.constant 0 : index
    %58 = vector.load %arg13[%c0_25, %c0_26] : memref<64x32xf32, #tpu.memory_space<vmem>>, vector<8x32xf32>
    tpu.vector_store %arg13[%c0_25, %c0_26], %42 {strides = array<i32>} : memref<64x32xf32, #tpu.memory_space<vmem>>, vector<8x32xf32>,
    %c56_27 = arith.constant 56 : index
    %c0_28 = arith.constant 0 : index
    %59 = vector.load %arg14[%c56_27, %c0_28] : memref<64x32xf32, #tpu.memory_space<vmem>>, vector<8x32xf32>
    tpu.vector_store %arg14[%c56_27, %c0_28], %57 {strides = array<i32>} : memref<64x32xf32, #tpu.memory_space<vmem>>, vector<8x32xf32>,
    %60 = tpu.concatenate %42, %57 in 1 : vector<8x32xf32>, vector<8x32xf32> -> vector<8x64xf32>
    %cst_29 = arith.constant dense<0.000000e+00> : vector<8x256xf32>
    %61 = tpu.matmul %60, %15, %cst_29 {dimension_numbers = #tpu.dot_dimension_numbers<[1], [0], [0], [1], [0, 0, 1, 1], [], []>} : vector<8x64xf32>, vector<64x256xf32>, vector<8x256xf32> -> vector<8x256xf32>
    %c8 = arith.constant 8 : index
    %c0_30 = arith.constant 0 : index
    %62 = vector.load %arg12[%c8, %c0_30] : memref<64x256xf32, #tpu.memory_space<vmem>>, vector<8x128xf32>
    %63 = vector.extract_strided_slice %61 {offsets = [0, 0], sizes = [8, 128], strides = [1, 1]} : vector<8x256xf32> to vector<8x128xf32>
    %64 = arith.addf %62, %63 : vector<8x128xf32>
    %c48 = arith.constant 48 : index
    %c128_31 = arith.constant 128 : index
    %65 = vector.load %arg12[%c48, %c128_31] : memref<64x256xf32, #tpu.memory_space<vmem>>, vector<8x128xf32>
    %66 = vector.extract_strided_slice %61 {offsets = [0, 128], sizes = [8, 128], strides = [1, 1]} : vector<8x256xf32> to vector<8x128xf32>
    %67 = arith.addf %65, %66 : vector<8x128xf32>
    %68 = arith.negf %64 : vector<8x128xf32>
    %69 = math.exp %68 : vector<8x128xf32>
    %cst_32 = arith.constant 1.000000e+00 : f32
    %70 = vector.broadcast %cst_32 : f32 to vector<8x128xf32>
    %71 = arith.addf %70, %69 : vector<8x128xf32>
    %72 = arith.divf %70, %71 : vector<8x128xf32>
    %73 = math.tanh %64 : vector<8x128xf32>
    %74 = vector.extract_strided_slice %72 {offsets = [0, 0], sizes = [8, 32], strides = [1, 1]} : vector<8x128xf32> to vector<8x32xf32>
    %75 = vector.extract_strided_slice %72 {offsets = [0, 32], sizes = [8, 32], strides = [1, 1]} : vector<8x128xf32> to vector<8x32xf32>
    %76 = vector.extract_strided_slice %73 {offsets = [0, 64], sizes = [8, 32], strides = [1, 1]} : vector<8x128xf32> to vector<8x32xf32>
    %77 = vector.extract_strided_slice %72 {offsets = [0, 96], sizes = [8, 32], strides = [1, 1]} : vector<8x128xf32> to vector<8x32xf32>
    %78 = arith.mulf %75, %40 : vector<8x32xf32>
    %79 = arith.mulf %74, %76 : vector<8x32xf32>
    %80 = arith.addf %78, %79 : vector<8x32xf32>
    %81 = math.tanh %80 : vector<8x32xf32>
    %82 = arith.mulf %77, %81 : vector<8x32xf32>
    %83 = arith.negf %67 : vector<8x128xf32>
    %84 = math.exp %83 : vector<8x128xf32>
    %cst_33 = arith.constant 1.000000e+00 : f32
    %85 = vector.broadcast %cst_33 : f32 to vector<8x128xf32>
    %86 = arith.addf %85, %84 : vector<8x128xf32>
    %87 = arith.divf %85, %86 : vector<8x128xf32>
    %88 = math.tanh %67 : vector<8x128xf32>
    %89 = vector.extract_strided_slice %87 {offsets = [0, 0], sizes = [8, 32], strides = [1, 1]} : vector<8x128xf32> to vector<8x32xf32>
    %90 = vector.extract_strided_slice %87 {offsets = [0, 32], sizes = [8, 32], strides = [1, 1]} : vector<8x128xf32> to vector<8x32xf32>
    %91 = vector.extract_strided_slice %88 {offsets = [0, 64], sizes = [8, 32], strides = [1, 1]} : vector<8x128xf32> to vector<8x32xf32>
    %92 = vector.extract_strided_slice %87 {offsets = [0, 96], sizes = [8, 32], strides = [1, 1]} : vector<8x128xf32> to vector<8x32xf32>
    %93 = arith.mulf %90, %55 : vector<8x32xf32>
    %94 = arith.mulf %89, %91 : vector<8x32xf32>
    %95 = arith.addf %93, %94 : vector<8x32xf32>
    %96 = math.tanh %95 : vector<8x32xf32>
    %97 = arith.mulf %92, %96 : vector<8x32xf32>
    %c8_34 = arith.constant 8 : index
    %c0_35 = arith.constant 0 : index
    %98 = vector.load %arg13[%c8_34, %c0_35] : memref<64x32xf32, #tpu.memory_space<vmem>>, vector<8x32xf32>
    tpu.vector_store %arg13[%c8_34, %c0_35], %82 {strides = array<i32>} : memref<64x32xf32, #tpu.memory_space<vmem>>, vector<8x32xf32>,
    %c48_36 = arith.constant 48 : index
    %c0_37 = arith.constant 0 : index
    %99 = vector.load %arg14[%c48_36, %c0_37] : memref<64x32xf32, #tpu.memory_space<vmem>>, vector<8x32xf32>
    tpu.vector_store %arg14[%c48_36, %c0_37], %97 {strides = array<i32>} : memref<64x32xf32, #tpu.memory_space<vmem>>, vector<8x32xf32>,
    %100 = tpu.concatenate %82, %97 in 1 : vector<8x32xf32>, vector<8x32xf32> -> vector<8x64xf32>
    %cst_38 = arith.constant dense<0.000000e+00> : vector<8x256xf32>
    %101 = tpu.matmul %100, %15, %cst_38 {dimension_numbers = #tpu.dot_dimension_numbers<[1], [0], [0], [1], [0, 0, 1, 1], [], []>} : vector<8x64xf32>, vector<64x256xf32>, vector<8x256xf32> -> vector<8x256xf32>
    %c16 = arith.constant 16 : index
    %c0_39 = arith.constant 0 : index
    %102 = vector.load %arg12[%c16, %c0_39] : memref<64x256xf32, #tpu.memory_space<vmem>>, vector<8x128xf32>
    %103 = vector.extract_strided_slice %101 {offsets = [0, 0], sizes = [8, 128], strides = [1, 1]} : vector<8x256xf32> to vector<8x128xf32>
    %104 = arith.addf %102, %103 : vector<8x128xf32>
    %c40 = arith.constant 40 : index
    %c128_40 = arith.constant 128 : index
    %105 = vector.load %arg12[%c40, %c128_40] : memref<64x256xf32, #tpu.memory_space<vmem>>, vector<8x128xf32>
    %106 = vector.extract_strided_slice %101 {offsets = [0, 128], sizes = [8, 128], strides = [1, 1]} : vector<8x256xf32> to vector<8x128xf32>
    %107 = arith.addf %105, %106 : vector<8x128xf32>
    %108 = arith.negf %104 : vector<8x128xf32>
    %109 = math.exp %108 : vector<8x128xf32>
    %cst_41 = arith.constant 1.000000e+00 : f32
    %110 = vector.broadcast %cst_41 : f32 to vector<8x128xf32>
    %111 = arith.addf %110, %109 : vector<8x128xf32>
    %112 = arith.divf %110, %111 : vector<8x128xf32>
    %113 = math.tanh %104 : vector<8x128xf32>
    %114 = vector.extract_strided_slice %112 {offsets = [0, 0], sizes = [8, 32], strides = [1, 1]} : vector<8x128xf32> to vector<8x32xf32>
    %115 = vector.extract_strided_slice %112 {offsets = [0, 32], sizes = [8, 32], strides = [1, 1]} : vector<8x128xf32> to vector<8x32xf32>
    %116 = vector.extract_strided_slice %113 {offsets = [0, 64], sizes = [8, 32], strides = [1, 1]} : vector<8x128xf32> to vector<8x32xf32>
    %117 = vector.extract_strided_slice %112 {offsets = [0, 96], sizes = [8, 32], strides = [1, 1]} : vector<8x128xf32> to vector<8x32xf32>
    %118 = arith.mulf %115, %80 : vector<8x32xf32>
    %119 = arith.mulf %114, %116 : vector<8x32xf32>
    %120 = arith.addf %118, %119 : vector<8x32xf32>
    %121 = math.tanh %120 : vector<8x32xf32>
    %122 = arith.mulf %117, %121 : vector<8x32xf32>
    %123 = arith.negf %107 : vector<8x128xf32>
    %124 = math.exp %123 : vector<8x128xf32>
    %cst_42 = arith.constant 1.000000e+00 : f32
    %125 = vector.broadcast %cst_42 : f32 to vector<8x128xf32>
    %126 = arith.addf %125, %124 : vector<8x128xf32>
    %127 = arith.divf %125, %126 : vector<8x128xf32>
    %128 = math.tanh %107 : vector<8x128xf32>
    %129 = vector.extract_strided_slice %127 {offsets = [0, 0], sizes = [8, 32], strides = [1, 1]} : vector<8x128xf32> to vector<8x32xf32>
    %130 = vector.extract_strided_slice %127 {offsets = [0, 32], sizes = [8, 32], strides = [1, 1]} : vector<8x128xf32> to vector<8x32xf32>
    %131 = vector.extract_strided_slice %128 {offsets = [0, 64], sizes = [8, 32], strides = [1, 1]} : vector<8x128xf32> to vector<8x32xf32>
    %132 = vector.extract_strided_slice %127 {offsets = [0, 96], sizes = [8, 32], strides = [1, 1]} : vector<8x128xf32> to vector<8x32xf32>
    %133 = arith.mulf %130, %95 : vector<8x32xf32>
    %134 = arith.mulf %129, %131 : vector<8x32xf32>
    %135 = arith.addf %133, %134 : vector<8x32xf32>
    %136 = math.tanh %135 : vector<8x32xf32>
    %137 = arith.mulf %132, %136 : vector<8x32xf32>
    %c16_43 = arith.constant 16 : index
    %c0_44 = arith.constant 0 : index
    %138 = vector.load %arg13[%c16_43, %c0_44] : memref<64x32xf32, #tpu.memory_space<vmem>>, vector<8x32xf32>
    tpu.vector_store %arg13[%c16_43, %c0_44], %122 {strides = array<i32>} : memref<64x32xf32, #tpu.memory_space<vmem>>, vector<8x32xf32>,
    %c40_45 = arith.constant 40 : index
    %c0_46 = arith.constant 0 : index
    %139 = vector.load %arg14[%c40_45, %c0_46] : memref<64x32xf32, #tpu.memory_space<vmem>>, vector<8x32xf32>
    tpu.vector_store %arg14[%c40_45, %c0_46], %137 {strides = array<i32>} : memref<64x32xf32, #tpu.memory_space<vmem>>, vector<8x32xf32>,
    %140 = tpu.concatenate %122, %137 in 1 : vector<8x32xf32>, vector<8x32xf32> -> vector<8x64xf32>
    %cst_47 = arith.constant dense<0.000000e+00> : vector<8x256xf32>
    %141 = tpu.matmul %140, %15, %cst_47 {dimension_numbers = #tpu.dot_dimension_numbers<[1], [0], [0], [1], [0, 0, 1, 1], [], []>} : vector<8x64xf32>, vector<64x256xf32>, vector<8x256xf32> -> vector<8x256xf32>
    %c24 = arith.constant 24 : index
    %c0_48 = arith.constant 0 : index
    %142 = vector.load %arg12[%c24, %c0_48] : memref<64x256xf32, #tpu.memory_space<vmem>>, vector<8x128xf32>
    %143 = vector.extract_strided_slice %141 {offsets = [0, 0], sizes = [8, 128], strides = [1, 1]} : vector<8x256xf32> to vector<8x128xf32>
    %144 = arith.addf %142, %143 : vector<8x128xf32>
    %c32 = arith.constant 32 : index
    %c128_49 = arith.constant 128 : index
    %145 = vector.load %arg12[%c32, %c128_49] : memref<64x256xf32, #tpu.memory_space<vmem>>, vector<8x128xf32>
    %146 = vector.extract_strided_slice %141 {offsets = [0, 128], sizes = [8, 128], strides = [1, 1]} : vector<8x256xf32> to vector<8x128xf32>
    %147 = arith.addf %145, %146 : vector<8x128xf32>
    %148 = arith.negf %144 : vector<8x128xf32>
    %149 = math.exp %148 : vector<8x128xf32>
    %cst_50 = arith.constant 1.000000e+00 : f32
    %150 = vector.broadcast %cst_50 : f32 to vector<8x128xf32>
    %151 = arith.addf %150, %149 : vector<8x128xf32>
    %152 = arith.divf %150, %151 : vector<8x128xf32>
    %153 = math.tanh %144 : vector<8x128xf32>
    %154 = vector.extract_strided_slice %152 {offsets = [0, 0], sizes = [8, 32], strides = [1, 1]} : vector<8x128xf32> to vector<8x32xf32>
    %155 = vector.extract_strided_slice %152 {offsets = [0, 32], sizes = [8, 32], strides = [1, 1]} : vector<8x128xf32> to vector<8x32xf32>
    %156 = vector.extract_strided_slice %153 {offsets = [0, 64], sizes = [8, 32], strides = [1, 1]} : vector<8x128xf32> to vector<8x32xf32>
    %157 = vector.extract_strided_slice %152 {offsets = [0, 96], sizes = [8, 32], strides = [1, 1]} : vector<8x128xf32> to vector<8x32xf32>
    %158 = arith.mulf %155, %120 : vector<8x32xf32>
    %159 = arith.mulf %154, %156 : vector<8x32xf32>
    %160 = arith.addf %158, %159 : vector<8x32xf32>
    %161 = math.tanh %160 : vector<8x32xf32>
    %162 = arith.mulf %157, %161 : vector<8x32xf32>
    %163 = arith.negf %147 : vector<8x128xf32>
    %164 = math.exp %163 : vector<8x128xf32>
    %cst_51 = arith.constant 1.000000e+00 : f32
    %165 = vector.broadcast %cst_51 : f32 to vector<8x128xf32>
    %166 = arith.addf %165, %164 : vector<8x128xf32>
    %167 = arith.divf %165, %166 : vector<8x128xf32>
    %168 = math.tanh %147 : vector<8x128xf32>
    %169 = vector.extract_strided_slice %167 {offsets = [0, 0], sizes = [8, 32], strides = [1, 1]} : vector<8x128xf32> to vector<8x32xf32>
    %170 = vector.extract_strided_slice %167 {offsets = [0, 32], sizes = [8, 32], strides = [1, 1]} : vector<8x128xf32> to vector<8x32xf32>
    %171 = vector.extract_strided_slice %168 {offsets = [0, 64], sizes = [8, 32], strides = [1, 1]} : vector<8x128xf32> to vector<8x32xf32>
    %172 = vector.extract_strided_slice %167 {offsets = [0, 96], sizes = [8, 32], strides = [1, 1]} : vector<8x128xf32> to vector<8x32xf32>
    %173 = arith.mulf %170, %135 : vector<8x32xf32>
    %174 = arith.mulf %169, %171 : vector<8x32xf32>
    %175 = arith.addf %173, %174 : vector<8x32xf32>
    %176 = math.tanh %175 : vector<8x32xf32>
    %177 = arith.mulf %172, %176 : vector<8x32xf32>
    %c24_52 = arith.constant 24 : index
    %c0_53 = arith.constant 0 : index
    %178 = vector.load %arg13[%c24_52, %c0_53] : memref<64x32xf32, #tpu.memory_space<vmem>>, vector<8x32xf32>
    tpu.vector_store %arg13[%c24_52, %c0_53], %162 {strides = array<i32>} : memref<64x32xf32, #tpu.memory_space<vmem>>, vector<8x32xf32>,
    %c32_54 = arith.constant 32 : index
    %c0_55 = arith.constant 0 : index
    %179 = vector.load %arg14[%c32_54, %c0_55] : memref<64x32xf32, #tpu.memory_space<vmem>>, vector<8x32xf32>
    tpu.vector_store %arg14[%c32_54, %c0_55], %177 {strides = array<i32>} : memref<64x32xf32, #tpu.memory_space<vmem>>, vector<8x32xf32>,
    %180 = tpu.concatenate %162, %177 in 1 : vector<8x32xf32>, vector<8x32xf32> -> vector<8x64xf32>
    %cst_56 = arith.constant dense<0.000000e+00> : vector<8x256xf32>
    %181 = tpu.matmul %180, %15, %cst_56 {dimension_numbers = #tpu.dot_dimension_numbers<[1], [0], [0], [1], [0, 0, 1, 1], [], []>} : vector<8x64xf32>, vector<64x256xf32>, vector<8x256xf32> -> vector<8x256xf32>
    %c32_57 = arith.constant 32 : index
    %c0_58 = arith.constant 0 : index
    %182 = vector.load %arg12[%c32_57, %c0_58] : memref<64x256xf32, #tpu.memory_space<vmem>>, vector<8x128xf32>
    %183 = vector.extract_strided_slice %181 {offsets = [0, 0], sizes = [8, 128], strides = [1, 1]} : vector<8x256xf32> to vector<8x128xf32>
    %184 = arith.addf %182, %183 : vector<8x128xf32>
    %c24_59 = arith.constant 24 : index
    %c128_60 = arith.constant 128 : index
    %185 = vector.load %arg12[%c24_59, %c128_60] : memref<64x256xf32, #tpu.memory_space<vmem>>, vector<8x128xf32>
    %186 = vector.extract_strided_slice %181 {offsets = [0, 128], sizes = [8, 128], strides = [1, 1]} : vector<8x256xf32> to vector<8x128xf32>
    %187 = arith.addf %185, %186 : vector<8x128xf32>
    %188 = arith.negf %184 : vector<8x128xf32>
    %189 = math.exp %188 : vector<8x128xf32>
    %cst_61 = arith.constant 1.000000e+00 : f32
    %190 = vector.broadcast %cst_61 : f32 to vector<8x128xf32>
    %191 = arith.addf %190, %189 : vector<8x128xf32>
    %192 = arith.divf %190, %191 : vector<8x128xf32>
    %193 = math.tanh %184 : vector<8x128xf32>
    %194 = vector.extract_strided_slice %192 {offsets = [0, 0], sizes = [8, 32], strides = [1, 1]} : vector<8x128xf32> to vector<8x32xf32>
    %195 = vector.extract_strided_slice %192 {offsets = [0, 32], sizes = [8, 32], strides = [1, 1]} : vector<8x128xf32> to vector<8x32xf32>
    %196 = vector.extract_strided_slice %193 {offsets = [0, 64], sizes = [8, 32], strides = [1, 1]} : vector<8x128xf32> to vector<8x32xf32>
    %197 = vector.extract_strided_slice %192 {offsets = [0, 96], sizes = [8, 32], strides = [1, 1]} : vector<8x128xf32> to vector<8x32xf32>
    %198 = arith.mulf %195, %160 : vector<8x32xf32>
    %199 = arith.mulf %194, %196 : vector<8x32xf32>
    %200 = arith.addf %198, %199 : vector<8x32xf32>
    %201 = math.tanh %200 : vector<8x32xf32>
    %202 = arith.mulf %197, %201 : vector<8x32xf32>
    %203 = arith.negf %187 : vector<8x128xf32>
    %204 = math.exp %203 : vector<8x128xf32>
    %cst_62 = arith.constant 1.000000e+00 : f32
    %205 = vector.broadcast %cst_62 : f32 to vector<8x128xf32>
    %206 = arith.addf %205, %204 : vector<8x128xf32>
    %207 = arith.divf %205, %206 : vector<8x128xf32>
    %208 = math.tanh %187 : vector<8x128xf32>
    %209 = vector.extract_strided_slice %207 {offsets = [0, 0], sizes = [8, 32], strides = [1, 1]} : vector<8x128xf32> to vector<8x32xf32>
    %210 = vector.extract_strided_slice %207 {offsets = [0, 32], sizes = [8, 32], strides = [1, 1]} : vector<8x128xf32> to vector<8x32xf32>
    %211 = vector.extract_strided_slice %208 {offsets = [0, 64], sizes = [8, 32], strides = [1, 1]} : vector<8x128xf32> to vector<8x32xf32>
    %212 = vector.extract_strided_slice %207 {offsets = [0, 96], sizes = [8, 32], strides = [1, 1]} : vector<8x128xf32> to vector<8x32xf32>
    %213 = arith.mulf %210, %175 : vector<8x32xf32>
    %214 = arith.mulf %209, %211 : vector<8x32xf32>
    %215 = arith.addf %213, %214 : vector<8x32xf32>
    %216 = math.tanh %215 : vector<8x32xf32>
    %217 = arith.mulf %212, %216 : vector<8x32xf32>
    %c32_63 = arith.constant 32 : index
    %c0_64 = arith.constant 0 : index
    %218 = vector.load %arg13[%c32_63, %c0_64] : memref<64x32xf32, #tpu.memory_space<vmem>>, vector<8x32xf32>
    tpu.vector_store %arg13[%c32_63, %c0_64], %202 {strides = array<i32>} : memref<64x32xf32, #tpu.memory_space<vmem>>, vector<8x32xf32>,
    %c24_65 = arith.constant 24 : index
    %c0_66 = arith.constant 0 : index
    %219 = vector.load %arg14[%c24_65, %c0_66] : memref<64x32xf32, #tpu.memory_space<vmem>>, vector<8x32xf32>
    tpu.vector_store %arg14[%c24_65, %c0_66], %217 {strides = array<i32>} : memref<64x32xf32, #tpu.memory_space<vmem>>, vector<8x32xf32>,
    %220 = tpu.concatenate %202, %217 in 1 : vector<8x32xf32>, vector<8x32xf32> -> vector<8x64xf32>
    %cst_67 = arith.constant dense<0.000000e+00> : vector<8x256xf32>
    %221 = tpu.matmul %220, %15, %cst_67 {dimension_numbers = #tpu.dot_dimension_numbers<[1], [0], [0], [1], [0, 0, 1, 1], [], []>} : vector<8x64xf32>, vector<64x256xf32>, vector<8x256xf32> -> vector<8x256xf32>
    %c40_68 = arith.constant 40 : index
    %c0_69 = arith.constant 0 : index
    %222 = vector.load %arg12[%c40_68, %c0_69] : memref<64x256xf32, #tpu.memory_space<vmem>>, vector<8x128xf32>
    %223 = vector.extract_strided_slice %221 {offsets = [0, 0], sizes = [8, 128], strides = [1, 1]} : vector<8x256xf32> to vector<8x128xf32>
    %224 = arith.addf %222, %223 : vector<8x128xf32>
    %c16_70 = arith.constant 16 : index
    %c128_71 = arith.constant 128 : index
    %225 = vector.load %arg12[%c16_70, %c128_71] : memref<64x256xf32, #tpu.memory_space<vmem>>, vector<8x128xf32>
    %226 = vector.extract_strided_slice %221 {offsets = [0, 128], sizes = [8, 128], strides = [1, 1]} : vector<8x256xf32> to vector<8x128xf32>
    %227 = arith.addf %225, %226 : vector<8x128xf32>
    %228 = arith.negf %224 : vector<8x128xf32>
    %229 = math.exp %228 : vector<8x128xf32>
    %cst_72 = arith.constant 1.000000e+00 : f32
    %230 = vector.broadcast %cst_72 : f32 to vector<8x128xf32>
    %231 = arith.addf %230, %229 : vector<8x128xf32>
    %232 = arith.divf %230, %231 : vector<8x128xf32>
    %233 = math.tanh %224 : vector<8x128xf32>
    %234 = vector.extract_strided_slice %232 {offsets = [0, 0], sizes = [8, 32], strides = [1, 1]} : vector<8x128xf32> to vector<8x32xf32>
    %235 = vector.extract_strided_slice %232 {offsets = [0, 32], sizes = [8, 32], strides = [1, 1]} : vector<8x128xf32> to vector<8x32xf32>
    %236 = vector.extract_strided_slice %233 {offsets = [0, 64], sizes = [8, 32], strides = [1, 1]} : vector<8x128xf32> to vector<8x32xf32>
    %237 = vector.extract_strided_slice %232 {offsets = [0, 96], sizes = [8, 32], strides = [1, 1]} : vector<8x128xf32> to vector<8x32xf32>
    %238 = arith.mulf %235, %200 : vector<8x32xf32>
    %239 = arith.mulf %234, %236 : vector<8x32xf32>
    %240 = arith.addf %238, %239 : vector<8x32xf32>
    %241 = math.tanh %240 : vector<8x32xf32>
    %242 = arith.mulf %237, %241 : vector<8x32xf32>
    %243 = arith.negf %227 : vector<8x128xf32>
    %244 = math.exp %243 : vector<8x128xf32>
    %cst_73 = arith.constant 1.000000e+00 : f32
    %245 = vector.broadcast %cst_73 : f32 to vector<8x128xf32>
    %246 = arith.addf %245, %244 : vector<8x128xf32>
    %247 = arith.divf %245, %246 : vector<8x128xf32>
    %248 = math.tanh %227 : vector<8x128xf32>
    %249 = vector.extract_strided_slice %247 {offsets = [0, 0], sizes = [8, 32], strides = [1, 1]} : vector<8x128xf32> to vector<8x32xf32>
    %250 = vector.extract_strided_slice %247 {offsets = [0, 32], sizes = [8, 32], strides = [1, 1]} : vector<8x128xf32> to vector<8x32xf32>
    %251 = vector.extract_strided_slice %248 {offsets = [0, 64], sizes = [8, 32], strides = [1, 1]} : vector<8x128xf32> to vector<8x32xf32>
    %252 = vector.extract_strided_slice %247 {offsets = [0, 96], sizes = [8, 32], strides = [1, 1]} : vector<8x128xf32> to vector<8x32xf32>
    %253 = arith.mulf %250, %215 : vector<8x32xf32>
    %254 = arith.mulf %249, %251 : vector<8x32xf32>
    %255 = arith.addf %253, %254 : vector<8x32xf32>
    %256 = math.tanh %255 : vector<8x32xf32>
    %257 = arith.mulf %252, %256 : vector<8x32xf32>
    %c40_74 = arith.constant 40 : index
    %c0_75 = arith.constant 0 : index
    %258 = vector.load %arg13[%c40_74, %c0_75] : memref<64x32xf32, #tpu.memory_space<vmem>>, vector<8x32xf32>
    tpu.vector_store %arg13[%c40_74, %c0_75], %242 {strides = array<i32>} : memref<64x32xf32, #tpu.memory_space<vmem>>, vector<8x32xf32>,
    %c16_76 = arith.constant 16 : index
    %c0_77 = arith.constant 0 : index
    %259 = vector.load %arg14[%c16_76, %c0_77] : memref<64x32xf32, #tpu.memory_space<vmem>>, vector<8x32xf32>
    tpu.vector_store %arg14[%c16_76, %c0_77], %257 {strides = array<i32>} : memref<64x32xf32, #tpu.memory_space<vmem>>, vector<8x32xf32>,
    %260 = tpu.concatenate %242, %257 in 1 : vector<8x32xf32>, vector<8x32xf32> -> vector<8x64xf32>
    %cst_78 = arith.constant dense<0.000000e+00> : vector<8x256xf32>
    %261 = tpu.matmul %260, %15, %cst_78 {dimension_numbers = #tpu.dot_dimension_numbers<[1], [0], [0], [1], [0, 0, 1, 1], [], []>} : vector<8x64xf32>, vector<64x256xf32>, vector<8x256xf32> -> vector<8x256xf32>
    %c48_79 = arith.constant 48 : index
    %c0_80 = arith.constant 0 : index
    %262 = vector.load %arg12[%c48_79, %c0_80] : memref<64x256xf32, #tpu.memory_space<vmem>>, vector<8x128xf32>
    %263 = vector.extract_strided_slice %261 {offsets = [0, 0], sizes = [8, 128], strides = [1, 1]} : vector<8x256xf32> to vector<8x128xf32>
    %264 = arith.addf %262, %263 : vector<8x128xf32>
    %c8_81 = arith.constant 8 : index
    %c128_82 = arith.constant 128 : index
    %265 = vector.load %arg12[%c8_81, %c128_82] : memref<64x256xf32, #tpu.memory_space<vmem>>, vector<8x128xf32>
    %266 = vector.extract_strided_slice %261 {offsets = [0, 128], sizes = [8, 128], strides = [1, 1]} : vector<8x256xf32> to vector<8x128xf32>
    %267 = arith.addf %265, %266 : vector<8x128xf32>
    %268 = arith.negf %264 : vector<8x128xf32>
    %269 = math.exp %268 : vector<8x128xf32>
    %cst_83 = arith.constant 1.000000e+00 : f32
    %270 = vector.broadcast %cst_83 : f32 to vector<8x128xf32>
    %271 = arith.addf %270, %269 : vector<8x128xf32>
    %272 = arith.divf %270, %271 : vector<8x128xf32>
    %273 = math.tanh %264 : vector<8x128xf32>
    %274 = vector.extract_strided_slice %272 {offsets = [0, 0], sizes = [8, 32], strides = [1, 1]} : vector<8x128xf32> to vector<8x32xf32>
    %275 = vector.extract_strided_slice %272 {offsets = [0, 32], sizes = [8, 32], strides = [1, 1]} : vector<8x128xf32> to vector<8x32xf32>
    %276 = vector.extract_strided_slice %273 {offsets = [0, 64], sizes = [8, 32], strides = [1, 1]} : vector<8x128xf32> to vector<8x32xf32>
    %277 = vector.extract_strided_slice %272 {offsets = [0, 96], sizes = [8, 32], strides = [1, 1]} : vector<8x128xf32> to vector<8x32xf32>
    %278 = arith.mulf %275, %240 : vector<8x32xf32>
    %279 = arith.mulf %274, %276 : vector<8x32xf32>
    %280 = arith.addf %278, %279 : vector<8x32xf32>
    %281 = math.tanh %280 : vector<8x32xf32>
    %282 = arith.mulf %277, %281 : vector<8x32xf32>
    %283 = arith.negf %267 : vector<8x128xf32>
    %284 = math.exp %283 : vector<8x128xf32>
    %cst_84 = arith.constant 1.000000e+00 : f32
    %285 = vector.broadcast %cst_84 : f32 to vector<8x128xf32>
    %286 = arith.addf %285, %284 : vector<8x128xf32>
    %287 = arith.divf %285, %286 : vector<8x128xf32>
    %288 = math.tanh %267 : vector<8x128xf32>
    %289 = vector.extract_strided_slice %287 {offsets = [0, 0], sizes = [8, 32], strides = [1, 1]} : vector<8x128xf32> to vector<8x32xf32>
    %290 = vector.extract_strided_slice %287 {offsets = [0, 32], sizes = [8, 32], strides = [1, 1]} : vector<8x128xf32> to vector<8x32xf32>
    %291 = vector.extract_strided_slice %288 {offsets = [0, 64], sizes = [8, 32], strides = [1, 1]} : vector<8x128xf32> to vector<8x32xf32>
    %292 = vector.extract_strided_slice %287 {offsets = [0, 96], sizes = [8, 32], strides = [1, 1]} : vector<8x128xf32> to vector<8x32xf32>
    %293 = arith.mulf %290, %255 : vector<8x32xf32>
    %294 = arith.mulf %289, %291 : vector<8x32xf32>
    %295 = arith.addf %293, %294 : vector<8x32xf32>
    %296 = math.tanh %295 : vector<8x32xf32>
    %297 = arith.mulf %292, %296 : vector<8x32xf32>
    %c48_85 = arith.constant 48 : index
    %c0_86 = arith.constant 0 : index
    %298 = vector.load %arg13[%c48_85, %c0_86] : memref<64x32xf32, #tpu.memory_space<vmem>>, vector<8x32xf32>
    tpu.vector_store %arg13[%c48_85, %c0_86], %282 {strides = array<i32>} : memref<64x32xf32, #tpu.memory_space<vmem>>, vector<8x32xf32>,
    %c8_87 = arith.constant 8 : index
    %c0_88 = arith.constant 0 : index
    %299 = vector.load %arg14[%c8_87, %c0_88] : memref<64x32xf32, #tpu.memory_space<vmem>>, vector<8x32xf32>
    tpu.vector_store %arg14[%c8_87, %c0_88], %297 {strides = array<i32>} : memref<64x32xf32, #tpu.memory_space<vmem>>, vector<8x32xf32>,
    %300 = tpu.concatenate %282, %297 in 1 : vector<8x32xf32>, vector<8x32xf32> -> vector<8x64xf32>
    %cst_89 = arith.constant dense<0.000000e+00> : vector<8x256xf32>
    %301 = tpu.matmul %300, %15, %cst_89 {dimension_numbers = #tpu.dot_dimension_numbers<[1], [0], [0], [1], [0, 0, 1, 1], [], []>} : vector<8x64xf32>, vector<64x256xf32>, vector<8x256xf32> -> vector<8x256xf32>
    %c56_90 = arith.constant 56 : index
    %c0_91 = arith.constant 0 : index
    %302 = vector.load %arg12[%c56_90, %c0_91] : memref<64x256xf32, #tpu.memory_space<vmem>>, vector<8x128xf32>
    %303 = vector.extract_strided_slice %301 {offsets = [0, 0], sizes = [8, 128], strides = [1, 1]} : vector<8x256xf32> to vector<8x128xf32>
    %304 = arith.addf %302, %303 : vector<8x128xf32>
    %c0_92 = arith.constant 0 : index
    %c128_93 = arith.constant 128 : index
    %305 = vector.load %arg12[%c0_92, %c128_93] : memref<64x256xf32, #tpu.memory_space<vmem>>, vector<8x128xf32>
    %306 = vector.extract_strided_slice %301 {offsets = [0, 128], sizes = [8, 128], strides = [1, 1]} : vector<8x256xf32> to vector<8x128xf32>
    %307 = arith.addf %305, %306 : vector<8x128xf32>
    %308 = arith.negf %304 : vector<8x128xf32>
    %309 = math.exp %308 : vector<8x128xf32>
    %cst_94 = arith.constant 1.000000e+00 : f32
    %310 = vector.broadcast %cst_94 : f32 to vector<8x128xf32>
    %311 = arith.addf %310, %309 : vector<8x128xf32>
    %312 = arith.divf %310, %311 : vector<8x128xf32>
    %313 = math.tanh %304 : vector<8x128xf32>
    %314 = vector.extract_strided_slice %312 {offsets = [0, 0], sizes = [8, 32], strides = [1, 1]} : vector<8x128xf32> to vector<8x32xf32>
    %315 = vector.extract_strided_slice %312 {offsets = [0, 32], sizes = [8, 32], strides = [1, 1]} : vector<8x128xf32> to vector<8x32xf32>
    %316 = vector.extract_strided_slice %313 {offsets = [0, 64], sizes = [8, 32], strides = [1, 1]} : vector<8x128xf32> to vector<8x32xf32>
    %317 = vector.extract_strided_slice %312 {offsets = [0, 96], sizes = [8, 32], strides = [1, 1]} : vector<8x128xf32> to vector<8x32xf32>
    %318 = arith.mulf %315, %280 : vector<8x32xf32>
    %319 = arith.mulf %314, %316 : vector<8x32xf32>
    %320 = arith.addf %318, %319 : vector<8x32xf32>
    %321 = math.tanh %320 : vector<8x32xf32>
    %322 = arith.mulf %317, %321 : vector<8x32xf32>
    %323 = arith.negf %307 : vector<8x128xf32>
    %324 = math.exp %323 : vector<8x128xf32>
    %cst_95 = arith.constant 1.000000e+00 : f32
    %325 = vector.broadcast %cst_95 : f32 to vector<8x128xf32>
    %326 = arith.addf %325, %324 : vector<8x128xf32>
    %327 = arith.divf %325, %326 : vector<8x128xf32>
    %328 = math.tanh %307 : vector<8x128xf32>
    %329 = vector.extract_strided_slice %327 {offsets = [0, 0], sizes = [8, 32], strides = [1, 1]} : vector<8x128xf32> to vector<8x32xf32>
    %330 = vector.extract_strided_slice %327 {offsets = [0, 32], sizes = [8, 32], strides = [1, 1]} : vector<8x128xf32> to vector<8x32xf32>
    %331 = vector.extract_strided_slice %328 {offsets = [0, 64], sizes = [8, 32], strides = [1, 1]} : vector<8x128xf32> to vector<8x32xf32>
    %332 = vector.extract_strided_slice %327 {offsets = [0, 96], sizes = [8, 32], strides = [1, 1]} : vector<8x128xf32> to vector<8x32xf32>
    %333 = arith.mulf %330, %295 : vector<8x32xf32>
    %334 = arith.mulf %329, %331 : vector<8x32xf32>
    %335 = arith.addf %333, %334 : vector<8x32xf32>
    %336 = math.tanh %335 : vector<8x32xf32>
    %337 = arith.mulf %332, %336 : vector<8x32xf32>
    %c56_96 = arith.constant 56 : index
    %c0_97 = arith.constant 0 : index
    %338 = vector.load %arg13[%c56_96, %c0_97] : memref<64x32xf32, #tpu.memory_space<vmem>>, vector<8x32xf32>
    tpu.vector_store %arg13[%c56_96, %c0_97], %322 {strides = array<i32>} : memref<64x32xf32, #tpu.memory_space<vmem>>, vector<8x32xf32>,
    %c0_98 = arith.constant 0 : index
    %c0_99 = arith.constant 0 : index
    %339 = vector.load %arg14[%c0_98, %c0_99] : memref<64x32xf32, #tpu.memory_space<vmem>>, vector<8x32xf32>
    tpu.vector_store %arg14[%c0_98, %c0_99], %337 {strides = array<i32>} : memref<64x32xf32, #tpu.memory_space<vmem>>, vector<8x32xf32>,
    %c0_100 = arith.constant 0 : index
    %c0_101 = arith.constant 0 : index
    %340 = vector.load %arg13[%c0_100, %c0_101] : memref<64x32xf32, #tpu.memory_space<vmem>>, vector<64x32xf32>
    %c0_102 = arith.constant 0 : index
    %c0_103 = arith.constant 0 : index
    %341 = vector.load %arg8[%c0_102, %c0_103] : memref<32x4xf32, #tpu.memory_space<vmem>>, vector<32x4xf32>
    %cst_104 = arith.constant dense<0.000000e+00> : vector<64x4xf32>
    %342 = tpu.matmul %340, %341, %cst_104 {dimension_numbers = #tpu.dot_dimension_numbers<[1], [0], [0], [1], [0, 0, 1, 1], [], []>} : vector<64x32xf32>, vector<32x4xf32>, vector<64x4xf32> -> vector<64x4xf32>
    %c0_105 = arith.constant 0 : index
    %c0_106 = arith.constant 0 : index
    %343 = vector.load %arg14[%c0_105, %c0_106] : memref<64x32xf32, #tpu.memory_space<vmem>>, vector<64x32xf32>
    %c0_107 = arith.constant 0 : index
    %c0_108 = arith.constant 0 : index
    %344 = vector.load %arg9[%c0_107, %c0_108] : memref<32x4xf32, #tpu.memory_space<vmem>>, vector<32x4xf32>
    %cst_109 = arith.constant dense<0.000000e+00> : vector<64x4xf32>
    %345 = tpu.matmul %343, %344, %cst_109 {dimension_numbers = #tpu.dot_dimension_numbers<[1], [0], [0], [1], [0, 0, 1, 1], [], []>} : vector<64x32xf32>, vector<32x4xf32>, vector<64x4xf32> -> vector<64x4xf32>
    %346 = arith.addf %342, %345 : vector<64x4xf32>
    %c0_110 = arith.constant 0 : index
    %c0_111 = arith.constant 0 : index
    %347 = vector.load %arg10[%c0_110, %c0_111] : memref<1x4xf32, #tpu.memory_space<vmem>>, vector<1x4xf32>
    %348 = vector.broadcast %347 : vector<1x4xf32> to vector<64x4xf32>
    %349 = arith.addf %346, %348 : vector<64x4xf32>
    %350 = vector.extract_strided_slice %349 {offsets = [0, 0], sizes = [64, 3], strides = [1, 1]} : vector<64x4xf32> to vector<64x3xf32>
    %351 = arith.mulf %350, %350 : vector<64x3xf32>
    %cst_112 = arith.constant dense<0.000000e+00> : vector<64xf32>
    %352 = vector.multi_reduction <add>, %351, %cst_112 [1] : vector<64x3xf32> to vector<64xf32>
    %353 = vector.shape_cast %352 : vector<64xf32> to vector<64x1xf32>
    %c0_113 = arith.constant 0 : index
    %c0_114 = arith.constant 0 : index
    %c0_115 = arith.constant 0 : index
    %354 = vector.load %arg2[%c0_113, %c0_114, %c0_115] : memref<8x8x1xf32, #tpu.memory_space<vmem>>, vector<8x8x1xf32>
    %355 = vector.shape_cast %354 : vector<8x8x1xf32> to vector<64x1xf32>
    %cst_116 = arith.constant 9.99999996E-13 : f32
    %356 = vector.broadcast %cst_116 : f32 to vector<64x1xf32>
    %357 = arith.addf %353, %356 : vector<64x1xf32>
    %358 = math.rsqrt %357 : vector<64x1xf32>
    %359 = arith.mulf %358, %355 : vector<64x1xf32>
    %360 = vector.broadcast %359 : vector<64x1xf32> to vector<64x3xf32>
    %361 = arith.mulf %350, %360 : vector<64x3xf32>
    %362 = vector.extract_strided_slice %349 {offsets = [0, 3], sizes = [64, 1], strides = [1, 1]} : vector<64x4xf32> to vector<64x1xf32>
    %363 = tpu.concatenate %361, %362 in 1 : vector<64x3xf32>, vector<64x1xf32> -> vector<64x4xf32>
    %364 = vector.shape_cast %363 : vector<64x4xf32> to vector<8x8x4xf32>
    %c0_117 = arith.constant 0 : index
    %c0_118 = arith.constant 0 : index
    %c0_119 = arith.constant 0 : index
    %365 = vector.load %arg11[%c0_117, %c0_118, %c0_119] : memref<8x8x4xf32, #tpu.memory_space<vmem>>, vector<8x8x4xf32>
    tpu.vector_store %arg11[%c0_117, %c0_118, %c0_119], %364 {strides = array<i32>} : memref<8x8x4xf32, #tpu.memory_space<vmem>>, vector<8x8x4xf32>,
    return
  }
  func.func @transform_0(%arg0: i32) -> (i32, i32, i32) {
    %c0_i32 = arith.constant 0 : i32
    %c0_i32_0 = arith.constant 0 : i32
    %c0_i32_1 = arith.constant 0 : i32
    return %c0_i32, %arg0, %c0_i32_0 : i32, i32, i32
  }
  func.func @transform_1(%arg0: i32) -> (i32, i32, i32) {
    %c0_i32 = arith.constant 0 : i32
    %c0_i32_0 = arith.constant 0 : i32
    %c0_i32_1 = arith.constant 0 : i32
    return %c0_i32, %arg0, %c0_i32_0 : i32, i32, i32
  }
  func.func @transform_2(%arg0: i32) -> (i32, i32) {
    %c0_i32 = arith.constant 0 : i32
    %c0_i32_0 = arith.constant 0 : i32
    %c0_i32_1 = arith.constant 0 : i32
    return %c0_i32, %c0_i32_0 : i32, i32
  }
  func.func @transform_3(%arg0: i32) -> (i32, i32) {
    %c0_i32 = arith.constant 0 : i32
    %c0_i32_0 = arith.constant 0 : i32
    %c0_i32_1 = arith.constant 0 : i32
    return %c0_i32, %c0_i32_0 : i32, i32
  }
  func.func @transform_4(%arg0: i32) -> (i32, i32) {
    %c0_i32 = arith.constant 0 : i32
    %c0_i32_0 = arith.constant 0 : i32
    %c0_i32_1 = arith.constant 0 : i32
    return %c0_i32, %c0_i32_0 : i32, i32
  }
  func.func @transform_5(%arg0: i32) -> (i32, i32) {
    %c0_i32 = arith.constant 0 : i32
    %c0_i32_0 = arith.constant 0 : i32
    %c0_i32_1 = arith.constant 0 : i32
    return %c0_i32, %c0_i32_0 : i32, i32
  }
  func.func @transform_6(%arg0: i32) -> (i32, i32) {
    %c0_i32 = arith.constant 0 : i32
    %c0_i32_0 = arith.constant 0 : i32
    %c0_i32_1 = arith.constant 0 : i32
    return %c0_i32, %c0_i32_0 : i32, i32
  }
  func.func @transform_7(%arg0: i32) -> (i32, i32) {
    %c0_i32 = arith.constant 0 : i32
    %c0_i32_0 = arith.constant 0 : i32
    %c0_i32_1 = arith.constant 0 : i32
    return %c0_i32, %c0_i32_0 : i32, i32
  }
  func.func @transform_8(%arg0: i32) -> (i32, i32) {
    %c0_i32 = arith.constant 0 : i32
    %c0_i32_0 = arith.constant 0 : i32
    %c0_i32_1 = arith.constant 0 : i32
    return %c0_i32, %c0_i32_0 : i32, i32
  }
  func.func @transform_9(%arg0: i32) -> (i32, i32) {
    %c0_i32 = arith.constant 0 : i32
    %c0_i32_0 = arith.constant 0 : i32
    %c0_i32_1 = arith.constant 0 : i32
    return %c0_i32, %c0_i32_0 : i32, i32
  }
  func.func @transform_10(%arg0: i32) -> (i32, i32, i32) {
    %c0_i32 = arith.constant 0 : i32
    %c0_i32_0 = arith.constant 0 : i32
    %c0_i32_1 = arith.constant 0 : i32
    return %c0_i32, %arg0, %c0_i32_0 : i32, i32, i32
  }
}

</mosaic_0001>

<bundles_post_ra>
// kernel: model_b_forward.1
= control target key start
LH: loop header
LB: loop body
LE: loop exit
PB: predicated region body
PF: predicated region fallthrough
CT: control target
= control target key end

     0   :  { %vm54_vm0 = vcmask 261120   ;;  %v2404_v50 = vmov 0.0   ;;  %s2406_s22 = smov 32   ;;  %vm381_vm1 = vcmask 523264   ;;  %vm1803_vm2 = vcmask 23552   ;;  %s3024_s2 = inlined_call_operand.vmem [shape: f32[32,32], index: 2, kind: input, shape index: {}]   ;;  %s3025_s0 = inlined_call_operand.vmem [shape: f32[8,8,32], index: 0, kind: input, shape index: {}]   ;;  %s3026_s6 = inlined_call_operand.vmem [shape: f32[64,256], index: 6, kind: input, shape index: {}]   ;;  %s3027_s4 = inlined_call_operand.vmem [shape: f32[32,256], index: 4, kind: input, shape index: {}]   ;;  %s3028_s3 = inlined_call_operand.vmem [shape: f32[1,32], index: 3, kind: input, shape index: {}]   ;;  %s3029_s5 = inlined_call_operand.vmem [shape: f32[1,256], index: 5, kind: input, shape index: {}]   ;;  %s3030_s8 = inlined_call_operand.vmem [shape: f32[32,4], index: 8, kind: input, shape index: {}]   ;;  %s3031_s7 = inlined_call_operand.vmem [shape: f32[32,4], index: 7, kind: input, shape index: {}]   ;;  %s3032_s9 = inlined_call_operand.vmem [shape: f32[1,4], index: 9, kind: input, shape index: {}]   ;;  %s3033_s1 = inlined_call_operand.vmem [shape: f32[8,8,1], index: 1, kind: input, shape index: {}]   ;;  %s3034_s10 = inlined_call_operand.vmem [shape: f32[8,8,4], index: 10, kind: output, shape index: {}]  }
   0x1   :  { %v43_v0 = vld [vmem:[%s3024_s2] sm:$0xff]  ;;  %v44_v1 = vld [vmem:[%s3024_s2 + $0x8] sm:$0xff]  ;;  %v45_v2 = vld [vmem:[%s3024_s2 + $0x10] sm:$0xff]  ;;  %300 = vmatprep.mubr.f32.mxu1 %v2404_v50  ;;  %vm1916_vm3 = vcmask 31744  }
   0x2   :  { %v2082_v3 = vpack.c.bf16 %v44_v1, %v43_v0  ;;  %v46_v4 = vld [vmem:[%s3024_s2 + $0x18] sm:$0xff]  ;;  %v35_v5 = vld [vmem:[%s3025_s0] sm:$0xff]  ;;  %v366_v7 = vld [vmem:[%s3026_s6 + $0x8] sm:$0xff] }
   0x3   :  { %v2086_v6 = vpack.c.bf16 %v46_v4, %v45_v2  ;;  %2030 = vmatprep.mubr.msk.f32.mxu0 %vm54_vm0, %v35_v5  ;;  %v368_v8 = vld [vmem:[%s3026_s6 + $0x18] sm:$0xff]  ;;  %v365_v10 = vld [vmem:[%s3026_s6] sm:$0xff]  ;;  %v367_v11 = vld [vmem:[%s3026_s6 + $0x10] sm:$0xff] }
   0x4   :  { %2083 = vmatprep.subr.bf16.mxu0 %v2082_v3  ;;  %v2485_v9 = vpack.c.bf16 %v368_v8, %v366_v7  ;;  %v370_v12 = vld [vmem:[%s3026_s6 + $0x28] sm:$0xff]  ;;  %v372_v13 = vld [vmem:[%s3026_s6 + $0x38] sm:$0xff]  ;;  %v192_v16 = vld [vmem:[%s3027_s4] sm:$0xff]  ;;  %v2514_v19 = vpack.c.bf16 %v367_v11, %v365_v10 }
   0x5   :  { %2085 = vmatpush3.bf16.msra.mxu0 %v2082_v3  ;;  %v193_v14 = vld [vmem:[%s3027_s4 + $0x8] sm:$0xff]  ;;  %v195_v15 = vld [vmem:[%s3027_s4 + $0x18] sm:$0xff]  ;;  %v194_v17 = vld [vmem:[%s3027_s4 + $0x10] sm:$0xff]  ;;  %v2520_v23 = vpack.c.bf16 %v372_v13, %v370_v12 }
   0x6   :  { %2087 = vmatprep.subr.bf16.mxu0 %v2086_v6  ;;  %v36_v18 = vld [vmem:[%s3025_s0 + $0x8] sm:$0xff]  ;;  %v2090_v20 = vpack.c.bf16 %v195_v15, %v193_v14  ;;  %v2092_v21 = vpack.c.bf16 %v194_v17, %v192_v16  ;;  %v37_v22 = vld [vmem:[%s3025_s0 + $0x10] sm:$0xff]  ;;  %v369_v24 = vld [vmem:[%s3026_s6 + $0x20] sm:$0xff]  ;;  %v202_v15 = vlaneseq }
   0x7   :  { %v371_v25 = vld [vmem:[%s3026_s6 + $0x30] sm:$0xff]  ;;  %v38_v26 = vld [vmem:[%s3025_s0 + $0x18] sm:$0xff]  ;;  %v39_v28 = vld [vmem:[%s3025_s0 + $0x20] sm:$0xff] }
   0x8   :  { %2091 = vmatprep.subr.bf16.mxu1 %v2090_v20  ;;  %v2534_v27 = vpack.c.bf16 %v371_v25, %v369_v24  ;;  %v40_v29 = vld [vmem:[%s3025_s0 + $0x28] sm:$0xff]  ;;  %v41_v30 = vld [vmem:[%s3025_s0 + $0x30] sm:$0xff]  ;;  %v42_v31 = vld [vmem:[%s3025_s0 + $0x38] sm:$0xff]  ;;  %v203_v16 = vshrl.u32 %v202_v15, 7 }
   0x9   :  { %2089 = vmatpush3.bf16.msra.mxu0 %v2086_v6  ;;  %2093 = vmatpush1.bf16.msra.mxu1 %v2092_v21  ;;  %v374_v32 = vld [vmem:[%s3026_s6 + $0x48] sm:$0xff]  ;;  %v376_v33 = vld [vmem:[%s3026_s6 + $0x58] sm:$0xff]  ;;  %v373_v35 = vld [vmem:[%s3026_s6 + $0x40] sm:$0xff] }
   0xa   :  { %2099 = vmatprep.subr.bf16.mxu0 %v2485_v9  ;;  %v2561_v34 = vpack.c.bf16 %v376_v33, %v374_v32  ;;  %v375_v36 = vld [vmem:[%s3026_s6 + $0x50] sm:$0xff]  ;;  %v197_v38 = vld [vmem:[%s3027_s4 + $0x28] sm:$0xff]  ;;  %v199_v39 = vld [vmem:[%s3027_s4 + $0x38] sm:$0xff]  ;;  %v204_v17 = vsub.s32 0, %v203_v16  ;;  %v208_v20 = vsub.s32 1, %v203_v16 }
   0xb   :  { %v2569_v37 = vpack.c.bf16 %v375_v36, %v373_v35  ;;  %v2094_v40 = vpack.c.bf16 %v199_v39, %v197_v38  ;;  %v196_v41 = vld [vmem:[%s3027_s4 + $0x20] sm:$0xff]  ;;  %v198_v42 = vld [vmem:[%s3027_s4 + $0x30] sm:$0xff]  ;;  %v378_v44 = vld [vmem:[%s3026_s6 + $0x68] sm:$0xff] }
   0xc   :  { %2031 = vmatmul.mubr.msk.f32.vlgmr.msra.gmra.mrb[0].mxu0 %vm54_vm0, %v36_v18  ;;  %v2096_v43 = vpack.c.bf16 %v198_v42, %v196_v41  ;;  %v380_v45 = vld [vmem:[%s3026_s6 + $0x78] sm:$0xff]  ;;  %v377_v47 = vld [vmem:[%s3026_s6 + $0x60] sm:$0xff]  ;;  %v379_v48 = vld [vmem:[%s3026_s6 + $0x70] sm:$0xff] }
   0xd   :  { %2033 = vmatprep.mubr.msk.f32.mxu0 %vm54_vm0, %v37_v22  ;;  %2101 = vmatpush1.bf16.msra.mxu0 %v2514_v19  ;;  %v2591_v46 = vpack.c.bf16 %v380_v45, %v378_v44  ;;  %v2599_v49 = vpack.c.bf16 %v379_v48, %v377_v47  ;;  %v1929_v51 = vld [vmem:[%s3028_s3] ss:$0 sm:$0xff] }
   0xe   :  { %2103 = vmatprep.subr.bf16.mxu0 %v2520_v23  ;;  %2095 = vmatprep.subr.bf16.mxu1 %v2094_v40  ;;  %v200_v18 = vld [vmem:[%s3029_s5] sm:$0x3]  ;;  %s2405_s5 = smov 64  }
   0xf   :  { %2097 = vmatpush1.bf16.msra.mxu1 %v2096_v43  ;;  %v205_v21 = vrot.slane %v200_v18, %v204_v17  ;;  %v209_v22 = vrot.slane %v200_v18, %v208_v20 }
  0x10   :  { %2034 = vmatmul.mubr.msk.f32.gmra.mrb[2].mxu0 %vm54_vm0, %v38_v26  ;;  %2131 = vmatprep.subr.bf16.mxu1 %v2485_v9 }
  0x11   :  { %2036 = vmatprep.mubr.msk.f32.mxu0 %vm54_vm0, %v39_v28  ;;  %2105 = vmatpush1.bf16.msra.mxu0 %v2534_v27 }
  0x12   :  { %2107 = vmatprep.subr.bf16.mxu0 %v2561_v34 }
  0x14   :  { %2037 = vmatmul.mubr.msk.f32.gmra.mrb[4].mxu0 %vm54_vm0, %v40_v29 }
  0x15   :  { %2039 = vmatprep.mubr.msk.f32.mxu0 %vm54_vm0, %v41_v30  ;;  %2109 = vmatpush1.bf16.msra.mxu0 %v2569_v37 }
  0x16   :  { %2111 = vmatprep.subr.bf16.mxu0 %v2591_v46 }
  0x18   :  { %2040 = vmatmul.mubr.msk.f32.gmra.mrb[6].mxu0 %vm54_vm0, %v42_v31 }
  0x19   :  { %2113 = vmatpush1.bf16.msra.mxu0 %v2599_v49  ;;  %449 = vmatprep.mubr.f32.mxu0 %v2404_v50 }
  0x1a   :  { %2115 = vmatprep.subr.bf16.mxu0 %v2485_v9 }
  0x1c   :  { %450 = vmatmul.mubr.f32.vlgmr.msra.gmra.mrb[8].mxu0 %v2404_v50 }
  0x1d   :  { %2117 = vmatpush1.bf16.msra.mxu0 %v2514_v19  ;;  %589 = vmatprep.mubr.f32.mxu0 %v2404_v50 }
  0x1e   :  { %2119 = vmatprep.subr.bf16.mxu0 %v2520_v23 }
  0x21   :  { %2121 = vmatpush1.bf16.msra.mxu0 %v2534_v27 }
  0x22   :  { %2123 = vmatprep.subr.bf16.mxu0 %v2561_v34 }
  0x25   :  { %2125 = vmatpush1.bf16.msra.mxu0 %v2569_v37 }
  0x26   :  { %2127 = vmatprep.subr.bf16.mxu0 %v2591_v46 }
  0x29   :  { %2129 = vmatpush1.bf16.msra.mxu0 %v2599_v49 }
  0x2a   :  { %2147 = vmatprep.subr.bf16.mxu0 %v2485_v9 }
  0xdf   :  { %v2032_v52 = vpop.f32.mrb[0].mxu0 }
  0xe0   :  { %v145_v53 = vpop.f32.mrb[1].mxu0  ;;  %v151_v55 = vadd.f32 %v2032_v52, %v1929_v51 }
  0xe1   :  { %v146_v54 = vadd.f32 %v1929_v51, %v145_v53 }
  0xe2   :  { %v185_v60 = vmax.f32 %v151_v55, 0.0 }
  0xe3   :  { %v184_v56 = vmax.f32 %v146_v54, 0.0  ;;  %v2035_v57 = vpop.f32.mrb[2].mxu0 }
  0xe4   :  { %v155_v58 = vpop.f32.mrb[3].mxu0  ;;  %v161_v0 = vadd.f32 %v2035_v57, %v1929_v51 }
  0xe5   :  { %1938 = vmatmul.mubr.msk.f32.vlgmr.msra.gmra.mrb[0].mxu1 %vm54_vm0, %v184_v56  ;;  %v156_v59 = vadd.f32 %v1929_v51, %v155_v58 }
  0xe6   :  { %306 = vmatprep.mubr.f32.mxu1 %v2404_v50  ;;  %2133 = vmatpush1.bf16.msra.mxu1 %v2514_v19  ;;  %v187_v4 = vmax.f32 %v161_v0, 0.0 }
  0xe7   :  { %v2038_v61 = vpop.f32.mrb[4].mxu0  ;;  %2135 = vmatprep.subr.bf16.mxu1 %v2520_v23  ;;  %v186_v63 = vmax.f32 %v156_v59, 0.0 }
  0xe8   :  { %v165_v62 = vpop.f32.mrb[5].mxu0  ;;  %v171_v6 = vadd.f32 %v2038_v61, %v1929_v51 }
  0xe9   :  { %1939 = vmatmul.mubr.msk.f32.gmra.mrb[2].mxu1 %vm54_vm0, %v185_v60  ;;  %v166_v3 = vadd.f32 %v1929_v51, %v165_v62 }
  0xea   :  { %312 = vmatprep.mubr.f32.mxu1 %v2404_v50  ;;  %2137 = vmatpush1.bf16.msra.mxu1 %v2534_v27  ;;  %v189_v8 = vmax.f32 %v171_v6, 0.0 }
  0xeb   :  { %v2041_v1 = vpop.f32.mrb[6].mxu0  ;;  %2139 = vmatprep.subr.bf16.mxu1 %v2561_v34  ;;  %v188_v5 = vmax.f32 %v166_v3, 0.0 }
  0xec   :  { %v175_v2 = vpop.f32.mrb[7].mxu0  ;;  %v181_v11 = vadd.f32 %v2041_v1, %v1929_v51 }
  0xed   :  { %1940 = vmatmul.mubr.msk.f32.gmra.mrb[4].mxu1 %vm54_vm0, %v186_v63  ;;  %v176_v7 = vadd.f32 %v1929_v51, %v175_v2 }
  0xee   :  { %318 = vmatprep.mubr.f32.mxu1 %v2404_v50  ;;  %2141 = vmatpush1.bf16.msra.mxu1 %v2569_v37  ;;  %v191_v12 = vmax.f32 %v181_v11, 0.0 }
  0xef   :  { %2143 = vmatprep.subr.bf16.mxu1 %v2591_v46  ;;  %v190_v10 = vmax.f32 %v176_v7, 0.0  ;;  %v451_v13 = vpop.f32.mrb[8].mxu0 }
  0xf0   :  { %v453_v14 = vpop.f32.mrb[9].mxu0 }
  0xf1   :  { %1941 = vmatmul.mubr.msk.f32.gmra.mrb[6].mxu1 %vm54_vm0, %v187_v4 }
  0xf2   :  { %324 = vmatprep.mubr.f32.mxu1 %v2404_v50  ;;  %2145 = vmatpush1.bf16.msra.mxu1 %v2599_v49 }
  0xf3   :  { %2163 = vmatprep.subr.bf16.mxu1 %v2485_v9 }
  0xf5   :  { %1942 = vmatmul.mubr.msk.f32.gmra.mrb[8].mxu1 %vm54_vm0, %v188_v5 }
  0xf6   :  { %330 = vmatprep.mubr.f32.mxu1 %v2404_v50 }
  0xf9   :  { %1943 = vmatmul.mubr.msk.f32.gmra.mrb[10].mxu1 %vm54_vm0, %v189_v8 }
  0xfa   :  { %336 = vmatprep.mubr.f32.mxu1 %v2404_v50 }
  0xfd   :  { %1944 = vmatmul.mubr.msk.f32.gmra.mrb[12].mxu1 %vm54_vm0, %v190_v10 }
  0xfe   :  { %342 = vmatprep.mubr.f32.mxu1 %v2404_v50 }
 0x101   :  { %1945 = vmatmul.mubr.msk.f32.gmra.mrb[14].mxu1 %vm54_vm0, %v191_v12 }
 0x102   :  { %729 = vmatprep.mubr.f32.mxu1 %v2404_v50 }
 0x1b8   :  { %v302_v24 = vpop.f32.mrb[0].mxu1 }
 0x1b9   :  { %v303_v25 = vadd.f32 %v302_v24, %v205_v21  ;;  %v304_v26 = vpop.f32.mrb[1].mxu1 }
 0x1ba   :  { %v2647_v28 = vadd.f32 %v304_v26, %v209_v22 }
 0x1bb   :  { %v457_v29 = vadd.f32 %v451_v13, %v303_v25 }
 0x1bc   :  { %v308_v30 = vpop.f32.mrb[2].mxu1 }
 0x1bd   :  { %2260 = vtanh.f32 %v457_v29  ;;  %v2649_v31 = vadd.f32 %v308_v30, %v205_v21  ;;  %v310_v32 = vpop.f32.mrb[3].mxu1  ;;  %v1946_v2 = vmul.f32 -1.442695, %v457_v29 }
 0x1be   :  { %v2651_v33 = vadd.f32 %v310_v32, %v209_v22 }
 0x1c0   :  { %v314_v35 = vpop.f32.mrb[4].mxu1 }
 0x1c1   :  { %v2653_v36 = vadd.f32 %v314_v35, %v205_v21  ;;  %v316_v38 = vpop.f32.mrb[5].mxu1 }
 0x1c2   :  { %v2655_v39 = vadd.f32 %v316_v38, %v209_v22 }
 0x1c4   :  { %v320_v40 = vpop.f32.mrb[6].mxu1 }
 0x1c5   :  { %v2657_v41 = vadd.f32 %v320_v40, %v205_v21  ;;  %v322_v42 = vpop.f32.mrb[7].mxu1 }
 0x1c6   :  { %v2659_v43 = vadd.f32 %v322_v42, %v209_v22 }
 0x1c7   :  { %v2261_v44 = vpop.eup %2260 }
 0x1c8   :  { %v326_v45 = vpop.f32.mrb[8].mxu1  ;;  %469 = vrot.lane.b32.xlu0 %v2261_v44, %s2405_s5 }
 0x1c9   :  { %v2662_v47 = vadd.f32 %v326_v45, %v205_v21  ;;  %v328_v48 = vpop.f32.mrb[9].mxu1 }
 0x1ca   :  { %v2664_v51 = vadd.f32 %v328_v48, %v209_v22 }
 0x1cc   :  { %v332_v52 = vpop.f32.mrb[10].mxu1 }
 0x1cd   :  { %v2666_v53 = vadd.f32 %v332_v52, %v205_v21  ;;  %v334_v54 = vpop.f32.mrb[11].mxu1 }
 0x1ce   :  { %v2668_v55 = vadd.f32 %v334_v54, %v209_v22 }
 0x1d0   :  { %v338_v56 = vpop.f32.mrb[12].mxu1 }
 0x1d1   :  { %v2670_v57 = vadd.f32 %v338_v56, %v205_v21  ;;  %v340_v58 = vpop.f32.mrb[13].mxu1 }
 0x1d2   :  { %v2672_v59 = vadd.f32 %v340_v58, %v209_v22 }
 0x1d4   :  { %v344_v60 = vpop.f32.mrb[14].mxu1 }
 0x1d5   :  { %v2674_v61 = vadd.f32 %v344_v60, %v205_v21  ;;  %v346_v62 = vpop.f32.mrb[15].mxu1 }
 0x1d6   :  { %v347_v63 = vadd.f32 %v346_v62, %v209_v22 }
 0x1d8   :  { %v459_v0 = vadd.f32 %v453_v14, %v347_v63 }
 0x1da   :  { %2262 = vtanh.f32 %v459_v0  ;;  %v1947_v5 = vmul.f32 -1.442695, %v459_v0 }
 0x1db   :  { %2264 = vpow2.f32 %v1946_v2 }
 0x1e4   :  { %v2263_v1 = vpop.eup %2262 }
 0x1e5   :  { %493 = vrot.lane.b32.xlu0 %v2263_v1, %s2405_s5  ;;  %v2265_v3 = vpop.eup %2264 }
 0x1e6   :  { %v463_v4 = vadd.f32 1.0, %v2265_v3 }
 0x1e8   :  { %2266 = vrcp.f32 %v463_v4 }
 0x1e9   :  { %2268 = vpow2.f32 %v1947_v5 }
 0x1f2   :  { %v2267_v6 = vpop.eup %2266 }
 0x1f3   :  { %v2269_v10 = vpop.eup %2268  ;;  %v467_v15 = vmul.f32 0.0, %v2267_v6 }
 0x1f4   :  { %v487_v11 = vadd.f32 1.0, %v2269_v10 }
 0x1f6   :  { %2270 = vrcp.f32 %v487_v11 }
 0x200   :  { %v2271_v12 = vpop.eup %2270 }
 0x201   :  { %v491_v20 = vmul.f32 0.0, %v2271_v12 }
 0x23a   :  { %v470_v7 = vpop.permute.xlu0 %469 }
 0x23b   :  { %v472_v8 = vmul.f32 %v2267_v6, %v470_v7 }
 0x23d   :  { %474 = vrot.lane.b32.xlu1 %v472_v8, %s2406_s22 }
 0x257   :  { %v494_v13 = vpop.permute.xlu0 %493 }
 0x258   :  { %v496_v14 = vmul.f32 %v2271_v12, %v494_v13 }
 0x25a   :  { %498 = vrot.lane.b32.xlu1 %v496_v14, %s2406_s22 }
 0x2af   :  { %v475_v16 = vpop.permute.xlu1 %474 }
 0x2b0   :  { %v477_v17 = vadd.f32 %v475_v16, %v467_v15 }
 0x2b2   :  { %2272 = vtanh.f32 %v477_v17 }
 0x2bc   :  { %v2273_v18 = vpop.eup %2272 }
 0x2bd   :  { %480 = vrot.lane.b32.xlu0 %v2273_v18, %s2405_s5 }
 0x2cc   :  { %v499_v21 = vpop.permute.xlu1 %498 }
 0x2cd   :  { %v501_v22 = vadd.f32 %v499_v21, %v491_v20 }
 0x2cf   :  { %2274 = vtanh.f32 %v501_v22 }
 0x2d9   :  { %v2275_v24 = vpop.eup %2274 }
 0x2da   :  { %504 = vrot.lane.b32.xlu1 %v2275_v24, %s2405_s5 }
 0x32f   :  { %v481_v25 = vpop.permute.xlu0 %480 }
 0x330   :  { %v483_v26 = vmul.f32 %v2267_v6, %v481_v25 }
 0x332   :  { %509 = vrot.lane.b32.xlu0 %v483_v26, %s2406_s22 }
 0x34c   :  { %v505_v29 = vpop.permute.xlu1 %504 }
 0x34d   :  { %v2682_v30 = vmul.f32 %v2271_v12, %v505_v29 }
 0x34f   :  { %518 = vrot.lane.b32.xlu1 %v2682_v30, %s2405_s5 }
 0x3a4   :  { %v510_v32 = vpop.permute.xlu0 %509 }
 0x3a5   :  { %512 = vst.msk [vmem:[#allocation3] sm:$0xff] %vm54_vm0, %v510_v32 }
 0x3c1   :  { %v519_v35 = vpop.permute.xlu1 %518 }
 0x3c2   :  { %v521_v38 = vsel %vm54_vm0, %v510_v32, %v519_v35 }
 0x3c3   :  { %1948 = vmatmul.mubr.msk.f32.vlgmr.msra.gmra.mrb[10].mxu0 %vm381_vm1, %v521_v38 }
 0x3c4   :  { %2149 = vmatpush1.bf16.msra.mxu0 %v2514_v19  ;;  %869 = vmatprep.mubr.f32.mxu0 %v2404_v50 }
 0x3c5   :  { %2151 = vmatprep.subr.bf16.mxu0 %v2520_v23 }
 0x3c8   :  { %2153 = vmatpush1.bf16.msra.mxu0 %v2534_v27 }
 0x3c9   :  { %2155 = vmatprep.subr.bf16.mxu0 %v2561_v34 }
 0x3cc   :  { %2157 = vmatpush1.bf16.msra.mxu0 %v2569_v37 }
 0x3cd   :  { %2159 = vmatprep.subr.bf16.mxu0 %v2591_v46 }
 0x3d0   :  { %2161 = vmatpush1.bf16.msra.mxu0 %v2599_v49 }
 0x3d1   :  { %2179 = vmatprep.subr.bf16.mxu0 %v2485_v9 }
 0x496   :  { %v591_v40 = vpop.f32.mrb[10].mxu0 }
 0x497   :  { %v597_v42 = vadd.f32 %v591_v40, %v2649_v31  ;;  %v593_v44 = vpop.f32.mrb[11].mxu0 }
 0x498   :  { %v599_v45 = vadd.f32 %v593_v44, %v2672_v59 }
 0x499   :  { %2276 = vtanh.f32 %v597_v42  ;;  %v1949_v54 = vmul.f32 -1.442695, %v597_v42 }
 0x49a   :  { %2278 = vtanh.f32 %v599_v45  ;;  %v1950_v56 = vmul.f32 -1.442695, %v599_v45 }
 0x49b   :  { %2280 = vpow2.f32 %v1949_v54 }
 0x49c   :  { %2282 = vpow2.f32 %v1950_v56 }
 0x4a3   :  { %v2277_v48 = vpop.eup %2276 }
 0x4a4   :  { %v2279_v52 = vpop.eup %2278  ;;  %609 = vrot.lane.b32.xlu0 %v2277_v48, %s2405_s5 }
 0x4a5   :  { %633 = vrot.lane.b32.xlu1 %v2279_v52, %s2405_s5  ;;  %v2281_v58 = vpop.eup %2280 }
 0x4a6   :  { %v2283_v60 = vpop.eup %2282  ;;  %v603_v62 = vadd.f32 1.0, %v2281_v58 }
 0x4a7   :  { %v627_v63 = vadd.f32 1.0, %v2283_v60 }
 0x4a8   :  { %2284 = vrcp.f32 %v603_v62 }
 0x4a9   :  { %2286 = vrcp.f32 %v627_v63 }
 0x4b2   :  { %v2285_v31 = vpop.eup %2284 }
 0x4b3   :  { %v2287_v0 = vpop.eup %2286  ;;  %v607_v4 = vmul.f32 %v2285_v31, %v477_v17 }
 0x4b4   :  { %v631_v6 = vmul.f32 %v2287_v0, %v501_v22 }
 0x516   :  { %v610_v59 = vpop.permute.xlu0 %609 }
 0x517   :  { %v612_v1 = vmul.f32 %v2285_v31, %v610_v59  ;;  %v634_v2 = vpop.permute.xlu1 %633 }
 0x518   :  { %v636_v3 = vmul.f32 %v2287_v0, %v634_v2 }
 0x519   :  { %614 = vrot.lane.b32.xlu0 %v612_v1, %s2406_s22 }
 0x51a   :  { %638 = vrot.lane.b32.xlu1 %v636_v3, %s2406_s22 }
 0x58b   :  { %v615_v5 = vpop.permute.xlu0 %614 }
 0x58c   :  { %v617_v7 = vadd.f32 %v615_v5, %v607_v4  ;;  %v639_v8 = vpop.permute.xlu1 %638 }
 0x58d   :  { %v641_v10 = vadd.f32 %v639_v8, %v631_v6 }
 0x58e   :  { %2288 = vtanh.f32 %v617_v7 }
 0x58f   :  { %2290 = vtanh.f32 %v641_v10 }
 0x598   :  { %v2289_v11 = vpop.eup %2288 }
 0x599   :  { %v2291_v12 = vpop.eup %2290  ;;  %620 = vrot.lane.b32.xlu0 %v2289_v11, %s2405_s5 }
 0x59a   :  { %644 = vrot.lane.b32.xlu1 %v2291_v12, %s2405_s5 }
 0x60b   :  { %v621_v13 = vpop.permute.xlu0 %620 }
 0x60c   :  { %v623_v14 = vmul.f32 %v2285_v31, %v621_v13  ;;  %v645_v15 = vpop.permute.xlu1 %644 }
 0x60d   :  { %v2706_v16 = vmul.f32 %v2287_v0, %v645_v15 }
 0x60e   :  { %649 = vrot.lane.b32.xlu0 %v623_v14, %s2406_s22 }
 0x60f   :  { %658 = vrot.lane.b32.xlu1 %v2706_v16, %s2405_s5 }
 0x680   :  { %v650_v17 = vpop.permute.xlu0 %649 }
 0x681   :  { %652 = vst.msk [vmem:[#allocation3 + $0x8] sm:$0xff] %vm54_vm0, %v650_v17  ;;  %v659_v18 = vpop.permute.xlu1 %658 }
 0x682   :  { %v661_v20 = vsel %vm54_vm0, %v650_v17, %v659_v18 }
 0x683   :  { %1951 = vmatmul.mubr.msk.f32.vlgmr.msra.gmra.mrb[16].mxu1 %vm381_vm1, %v661_v20 }
 0x684   :  { %2165 = vmatpush1.bf16.msra.mxu1 %v2514_v19  ;;  %1009 = vmatprep.mubr.f32.mxu1 %v2404_v50 }
 0x685   :  { %2167 = vmatprep.subr.bf16.mxu1 %v2520_v23 }
 0x688   :  { %2169 = vmatpush1.bf16.msra.mxu1 %v2534_v27 }
 0x689   :  { %2171 = vmatprep.subr.bf16.mxu1 %v2561_v34 }
 0x68c   :  { %2173 = vmatpush1.bf16.msra.mxu1 %v2569_v37 }
 0x68d   :  { %2175 = vmatprep.subr.bf16.mxu1 %v2591_v46 }
 0x690   :  { %2177 = vmatpush1.bf16.msra.mxu1 %v2599_v49 }
 0x691   :  { %2195 = vmatprep.subr.bf16.mxu1 %v2485_v9 }
 0x756   :  { %v731_v21 = vpop.f32.mrb[16].mxu1 }
 0x757   :  { %v737_v22 = vadd.f32 %v731_v21, %v2653_v36  ;;  %v733_v24 = vpop.f32.mrb[17].mxu1 }
 0x758   :  { %v739_v25 = vadd.f32 %v733_v24, %v2668_v55 }
 0x759   :  { %2292 = vtanh.f32 %v737_v22  ;;  %v1952_v32 = vmul.f32 -1.442695, %v737_v22 }
 0x75a   :  { %2294 = vtanh.f32 %v739_v25  ;;  %v1953_v35 = vmul.f32 -1.442695, %v739_v25 }
 0x75b   :  { %2296 = vpow2.f32 %v1952_v32 }
 0x75c   :  { %2298 = vpow2.f32 %v1953_v35 }
 0x763   :  { %v2293_v26 = vpop.eup %2292 }
 0x764   :  { %v2295_v29 = vpop.eup %2294  ;;  %749 = vrot.lane.b32.xlu0 %v2293_v26, %s2405_s5 }
 0x765   :  { %773 = vrot.lane.b32.xlu1 %v2295_v29, %s2405_s5  ;;  %v2297_v38 = vpop.eup %2296 }
 0x766   :  { %v2299_v40 = vpop.eup %2298  ;;  %v743_v42 = vadd.f32 1.0, %v2297_v38 }
 0x767   :  { %v767_v44 = vadd.f32 1.0, %v2299_v40 }
 0x768   :  { %2300 = vrcp.f32 %v743_v42 }
 0x769   :  { %2302 = vrcp.f32 %v767_v44 }
 0x772   :  { %v2301_v36 = vpop.eup %2300 }
 0x773   :  { %v2303_v45 = vpop.eup %2302  ;;  %v747_v56 = vmul.f32 %v2301_v36, %v617_v7 }
 0x774   :  { %v771_v60 = vmul.f32 %v2303_v45, %v641_v10 }
 0x7d6   :  { %v750_v55 = vpop.permute.xlu0 %749 }
 0x7d7   :  { %v752_v48 = vmul.f32 %v2301_v36, %v750_v55  ;;  %v774_v52 = vpop.permute.xlu1 %773 }
 0x7d8   :  { %v776_v54 = vmul.f32 %v2303_v45, %v774_v52 }
 0x7d9   :  { %754 = vrot.lane.b32.xlu0 %v752_v48, %s2406_s22 }
 0x7da   :  { %778 = vrot.lane.b32.xlu1 %v776_v54, %s2406_s22 }
 0x84b   :  { %v755_v58 = vpop.permute.xlu0 %754 }
 0x84c   :  { %v757_v62 = vadd.f32 %v755_v58, %v747_v56  ;;  %v779_v63 = vpop.permute.xlu1 %778 }
 0x84d   :  { %v781_v31 = vadd.f32 %v779_v63, %v771_v60 }
 0x84e   :  { %2304 = vtanh.f32 %v757_v62 }
 0x84f   :  { %2306 = vtanh.f32 %v781_v31 }
 0x858   :  { %v2305_v59 = vpop.eup %2304 }
 0x859   :  { %v2307_v0 = vpop.eup %2306  ;;  %760 = vrot.lane.b32.xlu0 %v2305_v59, %s2405_s5 }
 0x85a   :  { %784 = vrot.lane.b32.xlu1 %v2307_v0, %s2405_s5 }
 0x8cb   :  { %v761_v1 = vpop.permute.xlu0 %760 }
 0x8cc   :  { %v763_v2 = vmul.f32 %v2301_v36, %v761_v1  ;;  %v785_v3 = vpop.permute.xlu1 %784 }
 0x8cd   :  { %v2731_v4 = vmul.f32 %v2303_v45, %v785_v3 }
 0x8ce   :  { %789 = vrot.lane.b32.xlu0 %v763_v2, %s2406_s22 }
 0x8cf   :  { %798 = vrot.lane.b32.xlu1 %v2731_v4, %s2405_s5 }
 0x940   :  { %v790_v5 = vpop.permute.xlu0 %789 }
 0x941   :  { %792 = vst.msk [vmem:[#allocation3 + $0x10] sm:$0xff] %vm54_vm0, %v790_v5  ;;  %v799_v6 = vpop.permute.xlu1 %798 }
 0x942   :  { %v801_v7 = vsel %vm54_vm0, %v790_v5, %v799_v6 }
 0x943   :  { %1954 = vmatmul.mubr.msk.f32.vlgmr.msra.gmra.mrb[12].mxu0 %vm381_vm1, %v801_v7 }
 0x944   :  { %2181 = vmatpush1.bf16.msra.mxu0 %v2514_v19  ;;  %1149 = vmatprep.mubr.f32.mxu0 %v2404_v50 }
 0x945   :  { %2183 = vmatprep.subr.bf16.mxu0 %v2520_v23 }
 0x948   :  { %2185 = vmatpush1.bf16.msra.mxu0 %v2534_v27 }
 0x949   :  { %2187 = vmatprep.subr.bf16.mxu0 %v2561_v34 }
 0x94c   :  { %2189 = vmatpush1.bf16.msra.mxu0 %v2569_v37 }
 0x94d   :  { %2191 = vmatprep.subr.bf16.mxu0 %v2591_v46 }
 0x950   :  { %2193 = vmatpush1.bf16.msra.mxu0 %v2599_v49 }
 0x951   :  { %2211 = vmatprep.subr.bf16.mxu0 %v2485_v9 }
 0xa16   :  { %v871_v8 = vpop.f32.mrb[12].mxu0 }
 0xa17   :  { %v877_v10 = vadd.f32 %v871_v8, %v2657_v41  ;;  %v873_v11 = vpop.f32.mrb[13].mxu0 }
 0xa18   :  { %v879_v12 = vadd.f32 %v873_v11, %v2664_v51 }
 0xa19   :  { %2308 = vtanh.f32 %v877_v10  ;;  %v1955_v15 = vmul.f32 -1.442695, %v877_v10 }
 0xa1a   :  { %2310 = vtanh.f32 %v879_v12  ;;  %v1956_v17 = vmul.f32 -1.442695, %v879_v12 }
 0xa1b   :  { %2312 = vpow2.f32 %v1955_v15 }
 0xa1c   :  { %2314 = vpow2.f32 %v1956_v17 }
 0xa23   :  { %v2309_v13 = vpop.eup %2308 }
 0xa24   :  { %v2311_v14 = vpop.eup %2310  ;;  %889 = vrot.lane.b32.xlu0 %v2309_v13, %s2405_s5 }
 0xa25   :  { %913 = vrot.lane.b32.xlu1 %v2311_v14, %s2405_s5  ;;  %v2313_v18 = vpop.eup %2312 }
 0xa26   :  { %v2315_v9 = vpop.eup %2314  ;;  %v883_v20 = vadd.f32 1.0, %v2313_v18 }
 0xa27   :  { %v907_v21 = vadd.f32 1.0, %v2315_v9 }
 0xa28   :  { %2316 = vrcp.f32 %v883_v20 }
 0xa29   :  { %2318 = vrcp.f32 %v907_v21 }
 0xa32   :  { %v2317_v41 = vpop.eup %2316 }
 0xa33   :  { %v2319_v22 = vpop.eup %2318  ;;  %v887_v29 = vmul.f32 %v2317_v41, %v757_v62 }
 0xa34   :  { %v911_v35 = vmul.f32 %v2319_v22, %v781_v31 }
 0xa96   :  { %v890_v51 = vpop.permute.xlu0 %889 }
 0xa97   :  { %v892_v24 = vmul.f32 %v2317_v41, %v890_v51  ;;  %v914_v25 = vpop.permute.xlu1 %913 }
 0xa98   :  { %v916_v26 = vmul.f32 %v2319_v22, %v914_v25 }
 0xa99   :  { %894 = vrot.lane.b32.xlu0 %v892_v24, %s2406_s22 }
 0xa9a   :  { %918 = vrot.lane.b32.xlu1 %v916_v26, %s2406_s22 }
 0xb0b   :  { %v895_v32 = vpop.permute.xlu0 %894 }
 0xb0c   :  { %v897_v38 = vadd.f32 %v895_v32, %v887_v29  ;;  %v919_v40 = vpop.permute.xlu1 %918 }
 0xb0d   :  { %v921_v42 = vadd.f32 %v919_v40, %v911_v35 }
 0xb0e   :  { %2320 = vtanh.f32 %v897_v38 }
 0xb0f   :  { %2322 = vtanh.f32 %v921_v42 }
 0xb18   :  { %v2321_v44 = vpop.eup %2320 }
 0xb19   :  { %v2323_v36 = vpop.eup %2322  ;;  %900 = vrot.lane.b32.xlu0 %v2321_v44, %s2405_s5 }
 0xb1a   :  { %924 = vrot.lane.b32.xlu1 %v2323_v36, %s2405_s5 }
 0xb8b   :  { %v901_v55 = vpop.permute.xlu0 %900 }
 0xb8c   :  { %v903_v45 = vmul.f32 %v2317_v41, %v901_v55  ;;  %v925_v48 = vpop.permute.xlu1 %924 }
 0xb8d   :  { %v2756_v52 = vmul.f32 %v2319_v22, %v925_v48 }
 0xb8e   :  { %929 = vrot.lane.b32.xlu0 %v903_v45, %s2406_s22 }
 0xb8f   :  { %938 = vrot.lane.b32.xlu1 %v2756_v52, %s2405_s5 }
 0xc00   :  { %v930_v54 = vpop.permute.xlu0 %929 }
 0xc01   :  { %932 = vst.msk [vmem:[#allocation3 + $0x18] sm:$0xff] %vm54_vm0, %v930_v54  ;;  %v939_v56 = vpop.permute.xlu1 %938 }
 0xc02   :  { %v941_v58 = vsel %vm54_vm0, %v930_v54, %v939_v56 }
 0xc03   :  { %1957 = vmatmul.mubr.msk.f32.vlgmr.msra.gmra.mrb[18].mxu1 %vm381_vm1, %v941_v58 }
 0xc04   :  { %2197 = vmatpush1.bf16.msra.mxu1 %v2514_v19  ;;  %1289 = vmatprep.mubr.f32.mxu1 %v2404_v50 }
 0xc05   :  { %2199 = vmatprep.subr.bf16.mxu1 %v2520_v23 }
 0xc08   :  { %2201 = vmatpush1.bf16.msra.mxu1 %v2534_v27 }
 0xc09   :  { %2203 = vmatprep.subr.bf16.mxu1 %v2561_v34 }
 0xc0c   :  { %2205 = vmatpush1.bf16.msra.mxu1 %v2569_v37 }
 0xc0d   :  { %2207 = vmatprep.subr.bf16.mxu1 %v2591_v46 }
 0xc10   :  { %2209 = vmatpush1.bf16.msra.mxu1 %v2599_v49 }
 0xcd6   :  { %v1011_v60 = vpop.f32.mrb[18].mxu1 }
 0xcd7   :  { %v1017_v62 = vadd.f32 %v1011_v60, %v2662_v47  ;;  %v1013_v63 = vpop.f32.mrb[19].mxu1 }
 0xcd8   :  { %v1019_v31 = vadd.f32 %v1013_v63, %v2659_v43 }
 0xcd9   :  { %2324 = vtanh.f32 %v1017_v62  ;;  %v1958_v1 = vmul.f32 -1.442695, %v1017_v62 }
 0xcda   :  { %2326 = vtanh.f32 %v1019_v31  ;;  %v1959_v2 = vmul.f32 -1.442695, %v1019_v31 }
 0xcdb   :  { %2328 = vpow2.f32 %v1958_v1 }
 0xcdc   :  { %2330 = vpow2.f32 %v1959_v2 }
 0xce3   :  { %v2325_v59 = vpop.eup %2324 }
 0xce4   :  { %v2327_v0 = vpop.eup %2326  ;;  %1029 = vrot.lane.b32.xlu0 %v2325_v59, %s2405_s5 }
 0xce5   :  { %1053 = vrot.lane.b32.xlu1 %v2327_v0, %s2405_s5  ;;  %v2329_v3 = vpop.eup %2328 }
 0xce6   :  { %v2331_v5 = vpop.eup %2330  ;;  %v1023_v6 = vadd.f32 1.0, %v2329_v3 }
 0xce7   :  { %v1047_v7 = vadd.f32 1.0, %v2331_v5 }
 0xce8   :  { %2332 = vrcp.f32 %v1023_v6 }
 0xce9   :  { %2334 = vrcp.f32 %v1047_v7 }
 0xcf2   :  { %v2333_v47 = vpop.eup %2332 }
 0xcf3   :  { %v2335_v8 = vpop.eup %2334  ;;  %v1027_v13 = vmul.f32 %v2333_v47, %v897_v38 }
 0xcf4   :  { %v1051_v15 = vmul.f32 %v2335_v8, %v921_v42 }
 0xd56   :  { %v1030_v43 = vpop.permute.xlu0 %1029 }
 0xd57   :  { %v1032_v10 = vmul.f32 %v2333_v47, %v1030_v43  ;;  %v1054_v11 = vpop.permute.xlu1 %1053 }
 0xd58   :  { %v1056_v12 = vmul.f32 %v2335_v8, %v1054_v11 }
 0xd59   :  { %1034 = vrot.lane.b32.xlu0 %v1032_v10, %s2406_s22 }
 0xd5a   :  { %1058 = vrot.lane.b32.xlu1 %v1056_v12, %s2406_s22 }
 0xdcb   :  { %v1035_v14 = vpop.permute.xlu0 %1034 }
 0xdcc   :  { %v1037_v17 = vadd.f32 %v1035_v14, %v1027_v13  ;;  %v1059_v18 = vpop.permute.xlu1 %1058 }
 0xdcd   :  { %v1061_v9 = vadd.f32 %v1059_v18, %v1051_v15 }
 0xdce   :  { %2336 = vtanh.f32 %v1037_v17 }
 0xdcf   :  { %2338 = vtanh.f32 %v1061_v9 }
 0xdd8   :  { %v2337_v20 = vpop.eup %2336 }
 0xdd9   :  { %v2339_v21 = vpop.eup %2338  ;;  %1040 = vrot.lane.b32.xlu0 %v2337_v20, %s2405_s5 }
 0xdda   :  { %1064 = vrot.lane.b32.xlu1 %v2339_v21, %s2405_s5 }
 0xe4b   :  { %v1041_v41 = vpop.permute.xlu0 %1040 }
 0xe4c   :  { %v1043_v51 = vmul.f32 %v2333_v47, %v1041_v41  ;;  %v1065_v22 = vpop.permute.xlu1 %1064 }
 0xe4d   :  { %v2780_v24 = vmul.f32 %v2335_v8, %v1065_v22 }
 0xe4e   :  { %1069 = vrot.lane.b32.xlu0 %v1043_v51, %s2406_s22 }
 0xe4f   :  { %1078 = vrot.lane.b32.xlu1 %v2780_v24, %s2405_s5 }
 0xec0   :  { %v1070_v25 = vpop.permute.xlu0 %1069 }
 0xec1   :  { %1072 = vst.msk [vmem:[#allocation3 + $0x20] sm:$0xff] %vm54_vm0, %v1070_v25  ;;  %v1079_v26 = vpop.permute.xlu1 %1078 }
 0xec2   :  { %v1081_v29 = vsel %vm54_vm0, %v1070_v25, %v1079_v26 }
 0xec3   :  { %1960 = vmatmul.mubr.msk.f32.vlgmr.msra.gmra.mrb[14].mxu0 %vm381_vm1, %v1081_v29 }
 0xec4   :  { %2213 = vmatpush1.bf16.msra.mxu0 %v2514_v19  ;;  %1429 = vmatprep.mubr.f32.mxu0 %v2404_v50 }
 0xec5   :  { %2215 = vmatprep.subr.bf16.mxu0 %v2520_v23 }
 0xec8   :  { %2217 = vmatpush1.bf16.msra.mxu0 %v2534_v27 }
 0xec9   :  { %2219 = vmatprep.subr.bf16.mxu0 %v2561_v34 }
 0xecc   :  { %2221 = vmatpush1.bf16.msra.mxu0 %v2569_v37 }
 0xecd   :  { %2223 = vmatprep.subr.bf16.mxu0 %v2591_v46 }
 0xed0   :  { %2225 = vmatpush1.bf16.msra.mxu0 %v2599_v49 }
 0xf96   :  { %v1151_v32 = vpop.f32.mrb[14].mxu0 }
 0xf97   :  { %v1157_v35 = vadd.f32 %v1151_v32, %v2666_v53  ;;  %v1153_v38 = vpop.f32.mrb[15].mxu0 }
 0xf98   :  { %v1159_v19 = vadd.f32 %v1153_v38, %v2655_v39 }
 0xf99   :  { %2340 = vtanh.f32 %v1157_v35  ;;  %v1961_v27 = vmul.f32 -1.442695, %v1157_v35 }
 0xf9a   :  { %2342 = vtanh.f32 %v1159_v19  ;;  %v1962_v34 = vmul.f32 -1.442695, %v1159_v19 }
 0xf9b   :  { %2344 = vpow2.f32 %v1961_v27 }
 0xf9c   :  { %2346 = vpow2.f32 %v1962_v34 }
 0xfa3   :  { %v2341_v50 = vpop.eup %2340 }
 0xfa4   :  { %v2343_v23 = vpop.eup %2342  ;;  %1169 = vrot.lane.b32.xlu0 %v2341_v50, %s2405_s5 }
 0xfa5   :  { %1193 = vrot.lane.b32.xlu1 %v2343_v23, %s2405_s5  ;;  %v2345_v37 = vpop.eup %2344 }
 0xfa6   :  { %v2347_v46 = vpop.eup %2346  ;;  %v1163_v49 = vadd.f32 1.0, %v2345_v37 }
 0xfa7   :  { %v1187_v40 = vadd.f32 1.0, %v2347_v46 }
 0xfa8   :  { %2348 = vrcp.f32 %v1163_v49 }
 0xfa9   :  { %2350 = vrcp.f32 %v1187_v40 }
 0xfb2   :  { %v2349_v53 = vpop.eup %2348 }
 0xfb3   :  { %v2351_v42 = vpop.eup %2350  ;;  %v1167_v45 = vmul.f32 %v2349_v53, %v1037_v17 }
 0xfb4   :  { %v1191_v54 = vmul.f32 %v2351_v42, %v1061_v9 }
0x1016   :  { %v1170_v39 = vpop.permute.xlu0 %1169 }
0x1017   :  { %v1172_v44 = vmul.f32 %v2349_v53, %v1170_v39  ;;  %v1194_v36 = vpop.permute.xlu1 %1193 }
0x1018   :  { %v1196_v55 = vmul.f32 %v2351_v42, %v1194_v36 }
0x1019   :  { %1174 = vrot.lane.b32.xlu0 %v1172_v44, %s2406_s22 }
0x101a   :  { %1198 = vrot.lane.b32.xlu1 %v1196_v55, %s2406_s22 }
0x108b   :  { %v1175_v48 = vpop.permute.xlu0 %1174 }
0x108c   :  { %v1177_v56 = vadd.f32 %v1175_v48, %v1167_v45  ;;  %v1199_v58 = vpop.permute.xlu1 %1198 }
0x108d   :  { %v1201_v60 = vadd.f32 %v1199_v58, %v1191_v54 }
0x108e   :  { %2352 = vtanh.f32 %v1177_v56 }
0x108f   :  { %2354 = vtanh.f32 %v1201_v60 }
0x1098   :  { %v2353_v62 = vpop.eup %2352 }
0x1099   :  { %v2355_v63 = vpop.eup %2354  ;;  %1180 = vrot.lane.b32.xlu0 %v2353_v62, %s2405_s5 }
0x109a   :  { %1204 = vrot.lane.b32.xlu1 %v2355_v63, %s2405_s5 }
0x110b   :  { %v1181_v31 = vpop.permute.xlu0 %1180 }
0x110c   :  { %v1183_v59 = vmul.f32 %v2349_v53, %v1181_v31  ;;  %v1205_v0 = vpop.permute.xlu1 %1204 }
0x110d   :  { %v2804_v1 = vmul.f32 %v2351_v42, %v1205_v0 }
0x110e   :  { %1209 = vrot.lane.b32.xlu0 %v1183_v59, %s2406_s22 }
0x110f   :  { %1218 = vrot.lane.b32.xlu1 %v2804_v1, %s2405_s5 }
0x1180   :  { %v1210_v2 = vpop.permute.xlu0 %1209 }
0x1181   :  { %1212 = vst.msk [vmem:[#allocation3 + $0x28] sm:$0xff] %vm54_vm0, %v1210_v2  ;;  %v1219_v3 = vpop.permute.xlu1 %1218 }
0x1182   :  { %v1221_v5 = vsel %vm54_vm0, %v1210_v2, %v1219_v3 }
0x1183   :  { %1963 = vmatmul.mubr.msk.f32.vlgmr.msra.gmra.mrb[20].mxu1 %vm381_vm1, %v1221_v5  ;;  %v1518_v5 = vld [vmem:[%s3030_s8] sm:$0xff] }
0x1256   :  { %v1291_v6 = vpop.f32.mrb[20].mxu1 }
0x1257   :  { %v1297_v7 = vadd.f32 %v1291_v6, %v2670_v57  ;;  %v1293_v47 = vpop.f32.mrb[21].mxu1  ;;  %v1519_v6 = vld [vmem:[%s3030_s8 + $0x8] sm:$0xff] }
0x1258   :  { %v1299_v43 = vadd.f32 %v1293_v47, %v2651_v33  ;;  %v1520_v47 = vld [vmem:[%s3030_s8 + $0x10] sm:$0xff] }
0x1259   :  { %2356 = vtanh.f32 %v1297_v7  ;;  %v1964_v11 = vmul.f32 -1.442695, %v1297_v7  ;;  %v2226_v7 = vpack.c.bf16 %v1519_v6, %v1518_v5 }
0x125a   :  { %2358 = vtanh.f32 %v1299_v43  ;;  %v1965_v12 = vmul.f32 -1.442695, %v1299_v43  ;;  %v1521_v43 = vld [vmem:[%s3030_s8 + $0x18] sm:$0xff] }
0x125b   :  { %2360 = vpow2.f32 %v1964_v11  ;;  %2242 = vmatprep.subr.bf16.mxu1 %v2226_v7  ;;  %2227 = vmatprep.subr.bf16.mxu0 %v2226_v7  ;;  %v1507_v11 = vld [vmem:[%s3031_s7 + $0x8] sm:$0xff] }
0x125c   :  { %2362 = vpow2.f32 %v1965_v12  ;;  %2244 = vmatpush3.bf16.msra.mxu1 %v2226_v7 }
0x1263   :  { %v2357_v8 = vpop.eup %2356 }
0x1264   :  { %v2359_v10 = vpop.eup %2358  ;;  %1309 = vrot.lane.b32.xlu0 %v2357_v8, %s2405_s5  ;;  %v2230_v8 = vpack.c.bf16 %v1521_v43, %v1520_v47 }
0x1265   :  { %1333 = vrot.lane.b32.xlu1 %v2359_v10, %s2405_s5  ;;  %v2361_v13 = vpop.eup %2360  ;;  %v1506_v10 = vld [vmem:[%s3031_s7] sm:$0xff] }
0x1266   :  { %v2363_v14 = vpop.eup %2362  ;;  %v1303_v15 = vadd.f32 1.0, %v2361_v13  ;;  %2243 = vmatprep.subr.bf16.mxu1 %v2230_v8  ;;  %v2234_v13 = vpack.c.bf16 %v1507_v11, %v1506_v10 }
0x1267   :  { %v1327_v17 = vadd.f32 1.0, %v2363_v14  ;;  %2245 = vmatpush3.bf16.msra.mxu1 %v2230_v8 }
0x1268   :  { %2364 = vrcp.f32 %v1303_v15  ;;  %2235 = vmatprep.subr.bf16.mxu1 %v2234_v13 }
0x1269   :  { %2366 = vrcp.f32 %v1327_v17 }
0x1272   :  { %v2365_v57 = vpop.eup %2364 }
0x1273   :  { %v2367_v18 = vpop.eup %2366  ;;  %v1307_v41 = vmul.f32 %v2365_v57, %v1177_v56 }
0x1274   :  { %v1331_v22 = vmul.f32 %v2367_v18, %v1201_v60 }
0x12d6   :  { %v1310_v33 = vpop.permute.xlu0 %1309 }
0x12d7   :  { %v1312_v9 = vmul.f32 %v2365_v57, %v1310_v33  ;;  %v1334_v20 = vpop.permute.xlu1 %1333 }
0x12d8   :  { %v1336_v21 = vmul.f32 %v2367_v18, %v1334_v20 }
0x12d9   :  { %1314 = vrot.lane.b32.xlu0 %v1312_v9, %s2406_s22 }
0x12da   :  { %1338 = vrot.lane.b32.xlu1 %v1336_v21, %s2406_s22 }
0x134b   :  { %v1315_v51 = vpop.permute.xlu0 %1314 }
0x134c   :  { %v1317_v25 = vadd.f32 %v1315_v51, %v1307_v41  ;;  %v1339_v26 = vpop.permute.xlu1 %1338 }
0x134d   :  { %v1341_v29 = vadd.f32 %v1339_v26, %v1331_v22  ;;  %v1499_v26 = vld [vmem:[#allocation3 + $0x8] sm:$0xff] }
0x134e   :  { %2368 = vtanh.f32 %v1317_v25 }
0x134f   :  { %2370 = vtanh.f32 %v1341_v29 }
0x1358   :  { %v2369_v32 = vpop.eup %2368 }
0x1359   :  { %v2371_v35 = vpop.eup %2370  ;;  %1320 = vrot.lane.b32.xlu0 %v2369_v32, %s2405_s5  ;;  %v1501_v32 = vld [vmem:[#allocation3 + $0x18] sm:$0xff] }
0x135a   :  { %1344 = vrot.lane.b32.xlu1 %v2371_v35, %s2405_s5  ;;  %v1502_v35 = vld [vmem:[#allocation3 + $0x20] sm:$0xff] }
0x13cb   :  { %v1321_v38 = vpop.permute.xlu0 %1320 }
0x13cc   :  { %v1323_v19 = vmul.f32 %v2365_v57, %v1321_v38  ;;  %v1345_v50 = vpop.permute.xlu1 %1344  ;;  %v1503_v38 = vld [vmem:[#allocation3 + $0x28] sm:$0xff] }
0x13cd   :  { %v2820_v23 = vmul.f32 %v2367_v18, %v1345_v50  ;;  %v1509_v18 = vld [vmem:[%s3031_s7 + $0x18] sm:$0xff] }
0x13ce   :  { %1349 = vrot.lane.b32.xlu0 %v1323_v19, %s2406_s22 }
0x13cf   :  { %1358 = vrot.lane.b32.xlu1 %v2820_v23, %s2405_s5 }
0x1440   :  { %v1350_v27 = vpop.permute.xlu0 %1349 }
0x1441   :  { %1352 = vst.msk [vmem:[#allocation3 + $0x30] sm:$0xff] %vm54_vm0, %v1350_v27  ;;  %v1359_v34 = vpop.permute.xlu1 %1358 }
0x1442   :  { %v1361_v37 = vsel %vm54_vm0, %v1350_v27, %v1359_v34 }
0x1443   :  { %1966 = vmatmul.mubr.msk.f32.vlgmr.msra.gmra.mrb[16].mxu0 %vm381_vm1, %v1361_v37 }
0x1444   :  { %2229 = vmatpush3.bf16.msra.mxu0 %v2226_v7 }
0x1445   :  { %2231 = vmatprep.subr.bf16.mxu0 %v2230_v8 }
0x1448   :  { %2233 = vmatpush3.bf16.msra.mxu0 %v2230_v8  ;;  %v1504_v19 = vld [vmem:[#allocation3 + $0x30] sm:$0xff] }
0x1516   :  { %v1431_v46 = vpop.f32.mrb[16].mxu0 }
0x1517   :  { %v1437_v49 = vadd.f32 %v1431_v46, %v2674_v61  ;;  %v1433_v40 = vpop.f32.mrb[17].mxu0 }
0x1518   :  { %v1439_v53 = vadd.f32 %v1433_v40, %v2647_v28 }
0x1519   :  { %2372 = vtanh.f32 %v1437_v49  ;;  %v1967_v44 = vmul.f32 -1.442695, %v1437_v49 }
0x151a   :  { %2374 = vtanh.f32 %v1439_v53  ;;  %v1968_v36 = vmul.f32 -1.442695, %v1439_v53 }
0x151b   :  { %2376 = vpow2.f32 %v1967_v44 }
0x151c   :  { %2378 = vpow2.f32 %v1968_v36  ;;  %v1985_v36 = vld [vmem:[%s3032_s9] ss:$0 sm:$0xff] }
0x1523   :  { %v2373_v39 = vpop.eup %2372 }
0x1524   :  { %v2375_v42 = vpop.eup %2374  ;;  %1449 = vrot.lane.b32.xlu1 %v2373_v39, %s2405_s5 }
0x1525   :  { %1473 = vrot.lane.b32.xlu0 %v2375_v42, %s2405_s5  ;;  %v2377_v55 = vpop.eup %2376 }
0x1526   :  { %v2379_v45 = vpop.eup %2378  ;;  %v1443_v48 = vadd.f32 1.0, %v2377_v55 }
0x1527   :  { %v1467_v54 = vadd.f32 1.0, %v2379_v45 }
0x1528   :  { %2380 = vrcp.f32 %v1443_v48 }
0x1529   :  { %2382 = vrcp.f32 %v1467_v54 }
0x1532   :  { %v2381_v61 = vpop.eup %2380 }
0x1533   :  { %v2383_v56 = vpop.eup %2382  ;;  %v1447_v63 = vmul.f32 %v2381_v61, %v1317_v25  ;;  %v1498_v25 = vld [vmem:[#allocation3] sm:$0xff] }
0x1534   :  { %v1471_v59 = vmul.f32 %v2383_v56, %v1341_v29  ;;  %v1500_v29 = vld [vmem:[#allocation3 + $0x10] sm:$0xff] }
0x1596   :  { %v1450_v28 = vpop.permute.xlu1 %1449 }
0x1597   :  { %v1452_v58 = vmul.f32 %v2381_v61, %v1450_v28  ;;  %v1474_v60 = vpop.permute.xlu0 %1473 }
0x1598   :  { %v1476_v62 = vmul.f32 %v2383_v56, %v1474_v60 }
0x1599   :  { %1454 = vrot.lane.b32.xlu1 %v1452_v58, %s2406_s22 }
0x159a   :  { %1478 = vrot.lane.b32.xlu0 %v1476_v62, %s2406_s22 }
0x160b   :  { %v1455_v31 = vpop.permute.xlu1 %1454 }
0x160c   :  { %v1457_v0 = vadd.f32 %v1455_v31, %v1447_v63  ;;  %v1479_v2 = vpop.permute.xlu0 %1478 }
0x160d   :  { %v1481_v3 = vadd.f32 %v1479_v2, %v1471_v59 }
0x160e   :  { %2384 = vtanh.f32 %v1457_v0 }
0x160f   :  { %2386 = vtanh.f32 %v1481_v3 }
0x1618   :  { %v2385_v12 = vpop.eup %2384 }
0x1619   :  { %v2387_v14 = vpop.eup %2386  ;;  %1460 = vrot.lane.b32.xlu1 %v2385_v12, %s2405_s5 }
0x161a   :  { %1484 = vrot.lane.b32.xlu0 %v2387_v14, %s2405_s5 }
0x161d   :  { %794 = vrot.lane.b32.xlu1 %v2731_v4, %s2406_s22 }
0x161e   :  { %934 = vrot.lane.b32.xlu0 %v2756_v52, %s2406_s22 }
0x1621   :  { %514 = vrot.lane.b32.xlu1 %v2682_v30, %s2406_s22 }
0x1622   :  { %654 = vrot.lane.b32.xlu0 %v2706_v16, %s2406_s22 }
0x1625   :  { %1354 = vrot.lane.b32.xlu1 %v2820_v23, %s2406_s22 }
0x1629   :  { %1074 = vrot.lane.b32.xlu1 %v2780_v24, %s2406_s22  ;;  %v1508_v24 = vld [vmem:[%s3031_s7 + $0x10] sm:$0xff] }
0x162a   :  { %v2238_v20 = vpack.c.bf16 %v1509_v18, %v1508_v24  ;;  %v2407_v18 = vmov 0  }
0x162b   :  { %2259 = vset.pattern.permute.xlu1 %v2407_v18  ;;  %2258 = vset.pattern.permute.xlu0 %v2407_v18 }
0x168b   :  { %v1461_v15 = vpop.permute.xlu1 %1460 }
0x168c   :  { %v1485_v17 = vpop.permute.xlu0 %1484  ;;  %v1463_v52 = vmul.f32 %v2381_v61, %v1461_v15 }
0x168d   :  { %v1487_v57 = vmul.f32 %v2383_v56, %v1485_v17 }
0x168f   :  { %v795_v33 = vpop.permute.xlu1 %794  ;;  %1494 = vrot.lane.b32.xlu0 %v1487_v57, %s2406_s22 }
0x1690   :  { %797 = vst.msk [vmem:[#allocation4 + $0x28] sm:$0xff] %vm54_vm0, %v795_v33  ;;  %v935_v4 = vpop.permute.xlu0 %934 }
0x1691   :  { %937 = vst.msk [vmem:[#allocation4 + $0x20] sm:$0xff] %vm54_vm0, %v935_v4 }
0x1693   :  { %v515_v30 = vpop.permute.xlu1 %514  ;;  %1214 = vrot.lane.b32.xlu0 %v2804_v1, %s2406_s22 }
0x1694   :  { %517 = vst.msk [vmem:[#allocation4 + $0x38] sm:$0xff] %vm54_vm0, %v515_v30  ;;  %v655_v16 = vpop.permute.xlu0 %654 }
0x1695   :  { %657 = vst.msk [vmem:[#allocation4 + $0x30] sm:$0xff] %vm54_vm0, %v655_v16 }
0x1697   :  { %v1355_v9 = vpop.permute.xlu1 %1354  ;;  %1489 = vrot.lane.b32.xlu0 %v1463_v52, %s2406_s22  ;;  %v1515_v21 = vld [vmem:[#allocation4 + $0x28] sm:$0xff] }
0x1698   :  { %1357 = vst.msk [vmem:[#allocation4 + $0x8] sm:$0xff] %vm54_vm0, %v1355_v9  ;;  %v1514_v1 = vld [vmem:[#allocation4 + $0x20] sm:$0xff] }
0x1699   :  { %2056 = vmatprep.mubr.msk.f32.mxu1 %vm54_vm0, %v1514_v1 }
0x169a   :  { %2057 = vmatmul.mubr.msk.f32.vlgmr.msra.gmra.mrb[22].mxu1 %vm54_vm0, %v1515_v21 }
0x169b   :  { %v1075_v41 = vpop.permute.xlu1 %1074  ;;  %2237 = vmatpush3.bf16.msra.mxu1 %v2234_v13  ;;  %v1517_v22 = vld [vmem:[#allocation4 + $0x38] sm:$0xff] }
0x169c   :  { %1077 = vst.msk [vmem:[#allocation4 + $0x18] sm:$0xff] %vm54_vm0, %v1075_v41  ;;  %v1516_v51 = vld [vmem:[#allocation4 + $0x30] sm:$0xff]  ;;  %2239 = vmatprep.subr.bf16.mxu1 %v2238_v20 }
0x169d   :  { %2059 = vmatprep.mubr.msk.f32.mxu1 %vm54_vm0, %v1516_v51 }
0x169e   :  { %2060 = vmatmul.mubr.msk.f32.gmra.mrb[24].mxu1 %vm54_vm0, %v1517_v22 }
0x169f   :  { %2241 = vmatpush3.bf16.msra.mxu1 %v2238_v20  ;;  %2070 = vmatprep.mubr.msk.f32.mxu1 %vm54_vm0, %v1498_v25  ;;  %v1511_v37 = vld [vmem:[#allocation4 + $0x8] sm:$0xff] }
0x16a2   :  { %2071 = vmatmul.mubr.msk.f32.vlgmr.msra.gmra.mrb[26].mxu1 %vm54_vm0, %v1499_v26 }
0x16a3   :  { %2073 = vmatprep.mubr.msk.f32.mxu1 %vm54_vm0, %v1500_v29  ;;  %v1513_v49 = vld [vmem:[#allocation4 + $0x18] sm:$0xff] }
0x16a6   :  { %2074 = vmatmul.mubr.msk.f32.gmra.mrb[28].mxu1 %vm54_vm0, %v1501_v32 }
0x16a7   :  { %2076 = vmatprep.mubr.msk.f32.mxu1 %vm54_vm0, %v1502_v35 }
0x16aa   :  { %2077 = vmatmul.mubr.msk.f32.gmra.mrb[22].mxu1 %vm54_vm0, %v1503_v38  ;;  %v1829_v38 = vld [vmem:[%s3033_s1 + $0x8] sm:$0xff] }
0x16ab   :  { %2079 = vmatprep.mubr.msk.f32.mxu1 %vm54_vm0, %v1504_v19  ;;  %v1828_v19 = vld [vmem:[%s3033_s1] sm:$0xff] }
0x1701   :  { %v1495_v50 = vpop.permute.xlu0 %1494 }
0x1702   :  { %1497 = vst.msk [vmem:[#allocation4] sm:$0xff] %vm54_vm0, %v1495_v50 }
0x1705   :  { %v1215_v23 = vpop.permute.xlu0 %1214 }
0x1706   :  { %1217 = vst.msk [vmem:[#allocation4 + $0x10] sm:$0xff] %vm54_vm0, %v1215_v23 }
0x1709   :  { %v1490_v27 = vpop.permute.xlu0 %1489  ;;  %v1510_v34 = vld [vmem:[#allocation4] sm:$0xff] }
0x170a   :  { %1492 = vst.msk [vmem:[#allocation3 + $0x38] sm:$0xff] %vm54_vm0, %v1490_v27  ;;  %2050 = vmatprep.mubr.msk.f32.mxu0 %vm54_vm0, %v1510_v34 }
0x170b   :  { %2051 = vmatmul.mubr.msk.f32.vlgmr.msra.gmra.mrb[18].mxu0 %vm54_vm0, %v1511_v37 }
0x170d   :  { %v1512_v46 = vld [vmem:[#allocation4 + $0x10] sm:$0xff] }
0x170e   :  { %2053 = vmatprep.mubr.msk.f32.mxu0 %vm54_vm0, %v1512_v46 }
0x170f   :  { %2054 = vmatmul.mubr.msk.f32.gmra.mrb[20].mxu0 %vm54_vm0, %v1513_v49  ;;  %v1832_v49 = vld [vmem:[%s3033_s1 + $0x20] sm:$0xff] }
0x1711   :  { %v1505_v40 = vld [vmem:[#allocation3 + $0x38] sm:$0xff] }
0x1712   :  { %2080 = vmatmul.mubr.msk.f32.gmra.mrb[24].mxu1 %vm54_vm0, %v1505_v40 }
0x1775   :  { %v2072_v53 = vpop.f32.mrb[26].mxu1 }
0x1776   :  { %v1741_v39 = vpop.f32.mrb[27].mxu1 }
0x1779   :  { %v2075_v42 = vpop.f32.mrb[28].mxu1 }
0x177a   :  { %v1751_v44 = vpop.f32.mrb[29].mxu1 }
0x177d   :  { %v2078_v55 = vpop.f32.mrb[22].mxu1 }
0x177e   :  { %v2904_v45 = vadd.f32 %v2078_v55, %v1985_v36  ;;  %v1761_v48 = vpop.f32.mrb[23].mxu1 }
0x177f   :  { %v2906_v54 = vadd.f32 %v1985_v36, %v1761_v48 }
0x1780   :  { %v1800_v61 = vmul.f32 %v2904_v45, %v2904_v45 }
0x1781   :  { %v1799_v28 = vmul.f32 %v2906_v54, %v2906_v54 }
0x1782   :  { %v1819_v56 = vsel %vm1803_vm2, %v1800_v61, 0.0  ;;  %v1834_v61 = vld [vmem:[%s3033_s1 + $0x30] sm:$0xff] }
0x1783   :  { %1820 = vadd.xlane.f32.xlu1 %v1819_v56  ;;  %v1816_v58 = vsel %vm1803_vm2, %v1799_v28, 0.0 }
0x1784   :  { %1817 = vadd.xlane.f32.xlu0 %v1816_v58  ;;  %v1831_v58 = vld [vmem:[%s3033_s1 + $0x18] sm:$0xff] }
0x17de   :  { %v2052_v60 = vpop.f32.mrb[18].mxu0 }
0x17df   :  { %v1747_v62 = vadd.f32 %v2072_v53, %v2052_v60  ;;  %v1612_v63 = vpop.f32.mrb[19].mxu0 }
0x17e0   :  { %v1742_v31 = vadd.f32 %v1741_v39, %v1612_v63  ;;  %v1830_v63 = vld [vmem:[%s3033_s1 + $0x10] sm:$0xff] }
0x17e1   :  { %v2914_v59 = vadd.f32 %v1985_v36, %v1747_v62 }
0x17e2   :  { %v2916_v0 = vadd.f32 %v1985_v36, %v1742_v31  ;;  %v2055_v2 = vpop.f32.mrb[20].mxu0 }
0x17e3   :  { %v1757_v3 = vadd.f32 %v2075_v42, %v2055_v2  ;;  %v1622_v5 = vpop.f32.mrb[21].mxu0  ;;  %v1796_v6 = vmul.f32 %v2914_v59, %v2914_v59 }
0x17e4   :  { %v1752_v7 = vadd.f32 %v1751_v44, %v1622_v5  ;;  %v1795_v47 = vmul.f32 %v2916_v0, %v2916_v0  ;;  %v1833_v44 = vld [vmem:[%s3033_s1 + $0x28] sm:$0xff] }
0x17e5   :  { %v2922_v43 = vadd.f32 %v1985_v36, %v1757_v3  ;;  %v2081_v8 = vpop.f32.mrb[24].mxu1  ;;  %v1807_v10 = vsel %vm1803_vm2, %v1796_v6, 0.0  ;;  %v1835_v3 = vld [vmem:[%s3033_s1 + $0x38] sm:$0xff] }
0x17e6   :  { %v2925_v11 = vadd.f32 %v1985_v36, %v1752_v7  ;;  %v2927_v12 = vadd.f32 %v2081_v8, %v1985_v36  ;;  %1808 = vadd.xlane.f32.xlu0 %v1807_v10  ;;  %v1771_v13 = vpop.f32.mrb[25].mxu1  ;;  %v1804_v14 = vsel %vm1803_vm2, %v1795_v47, 0.0 }
0x17e7   :  { %v2930_v15 = vadd.f32 %v1985_v36, %v1771_v13  ;;  %1805 = vadd.xlane.f32.xlu1 %v1804_v14  ;;  %v1798_v17 = vmul.f32 %v2922_v43, %v2922_v43 }
0x17e8   :  { %v1797_v57 = vmul.f32 %v2925_v11, %v2925_v11  ;;  %v1802_v16 = vmul.f32 %v2927_v12, %v2927_v12 }
0x17e9   :  { %v1813_v33 = vsel %vm1803_vm2, %v1798_v17, 0.0  ;;  %v1801_v30 = vmul.f32 %v2930_v15, %v2930_v15 }
0x17ea   :  { %v1810_v4 = vsel %vm1803_vm2, %v1797_v57, 0.0  ;;  %v1825_v24 = vsel %vm1803_vm2, %v1802_v16, 0.0 }
0x17eb   :  { %1811 = vadd.xlane.f32.xlu0 %v1810_v4  ;;  %1814 = vadd.xlane.f32.xlu1 %v1813_v33  ;;  %v1822_v52 = vsel %vm1803_vm2, %v1801_v30, 0.0 }
0x17ef   :  { %1823 = vadd.xlane.f32.xlu0 %v1822_v52  ;;  %1826 = vadd.xlane.f32.xlu1 %v1825_v24 }
0x1810   :  { %v1821_v1 = vpop.xlane.xlu1 %1820 }
0x1811   :  { %v1818_v9 = vpop.xlane.xlu0 %1817  ;;  %v1841_v25 = vadd.f32 1e-12, %v1821_v1 }
0x1812   :  { %v1840_v21 = vadd.f32 1e-12, %v1818_v9 }
0x1873   :  { %v1809_v20 = vpop.xlane.xlu0 %1808 }
0x1874   :  { %v1837_v41 = vadd.f32 1e-12, %v1809_v20  ;;  %v1806_v51 = vpop.xlane.xlu1 %1805 }
0x1875   :  { %v1836_v22 = vadd.f32 1e-12, %v1806_v51 }
0x1876   :  { %2388 = vrsqrt.f32 %v1837_v41 }
0x1877   :  { %2390 = vrsqrt.f32 %v1836_v22 }
0x1878   :  { %2392 = vrsqrt.f32 %v1840_v21  ;;  %v1812_v26 = vpop.xlane.xlu0 %1811  ;;  %v1815_v32 = vpop.xlane.xlu1 %1814 }
0x1879   :  { %2394 = vrsqrt.f32 %v1841_v25  ;;  %v1839_v23 = vadd.f32 1e-12, %v1815_v32  ;;  %v1838_v40 = vadd.f32 1e-12, %v1812_v26 }
0x187c   :  { %v1824_v29 = vpop.xlane.xlu0 %1823  ;;  %v1827_v53 = vpop.xlane.xlu1 %1826 }
0x187d   :  { %v1842_v35 = vadd.f32 1e-12, %v1824_v29  ;;  %v1843_v36 = vadd.f32 1e-12, %v1827_v53 }
0x187f   :  { %2396 = vrsqrt.f32 %v1842_v35 }
0x1880   :  { %v2389_v50 = vpop.eup %2388  ;;  %2398 = vrsqrt.f32 %v1839_v23 }
0x1881   :  { %v2391_v27 = vpop.eup %2390  ;;  %v1853_v34 = vmul.f32 %v2389_v50, %v1829_v38  ;;  %2400 = vrsqrt.f32 %v1838_v40 }
0x1882   :  { %v2393_v37 = vpop.eup %2392  ;;  %v1852_v46 = vmul.f32 %v2391_v27, %v1828_v19  ;;  %2402 = vrsqrt.f32 %v1843_v36 }
0x1883   :  { %1867 = vperm.xlu1 %2259, %v1853_v34   ;;  %v1856_v39 = vmul.f32 %v2393_v37, %v1832_v49  ;;  %v2395_v42 = vpop.eup %2394 }
0x1884   :  { %1862 = vperm.xlu0 %2258, %v1852_v46   ;;  %v1857_v55 = vmul.f32 %v2395_v42, %v1833_v44 }
0x1887   :  { %1882 = vperm.xlu1 %2259, %v1856_v39  }
0x1889   :  { %v2397_v48 = vpop.eup %2396 }
0x188a   :  { %v1858_v28 = vmul.f32 %v2397_v48, %v1834_v61  ;;  %v2399_v56 = vpop.eup %2398 }
0x188b   :  { %1887 = vperm.xlu1 %2259, %v1857_v55   ;;  %v1855_v60 = vmul.f32 %v2399_v56, %v1831_v58  ;;  %v2401_v62 = vpop.eup %2400 }
0x188c   :  { %v1854_v31 = vmul.f32 %v2401_v62, %v1830_v63  ;;  %v2403_v2 = vpop.eup %2402 }
0x188d   :  { %v1859_v5 = vmul.f32 %v2403_v2, %v1835_v3 }
0x188f   :  { %1892 = vperm.xlu1 %2259, %v1858_v28  }
0x1893   :  { %1877 = vperm.xlu1 %2259, %v1855_v60  }
0x1897   :  { %1872 = vperm.xlu1 %2259, %v1854_v31  }
0x189b   :  { %1897 = vperm.xlu1 %2259, %v1859_v5  }
0x1902   :  { %v1868_v6 = vpop.permute.xlu1 %1867 }
0x1903   :  { %v1901_v7 = vmul.f32 %v1868_v6, %v2914_v59  ;;  %v1863_v47 = vpop.permute.xlu0 %1862 }
0x1904   :  { %v1900_v8 = vmul.f32 %v1863_v47, %v2916_v0 }
0x1905   :  { %v1909_v10 = vsel %vm1803_vm2, %v1901_v7, %v2914_v59 }
0x1906   :  { %1918 = vst.msk [vmem:[%s3034_s10 + $0x8] sm:$0xff] %vm1916_vm3, %v1909_v10  ;;  %v1908_v13 = vsel %vm1803_vm2, %v1900_v8, %v2916_v0  ;;  %v1883_v14 = vpop.permute.xlu1 %1882 }
0x1907   :  { %1917 = vst.msk [vmem:[%s3034_s10] sm:$0xff] %vm1916_vm3, %v1908_v13  ;;  %v1904_v17 = vmul.f32 %v1883_v14, %v2906_v54 }
0x1909   :  { %v1912_v57 = vsel %vm1803_vm2, %v1904_v17, %v2906_v54 }
0x190a   :  { %1921 = vst.msk [vmem:[%s3034_s10 + $0x20] sm:$0xff] %vm1916_vm3, %v1912_v57  ;;  %v1888_v59 = vpop.permute.xlu1 %1887 }
0x190b   :  { %v1905_v33 = vmul.f32 %v1888_v59, %v2904_v45 }
0x190d   :  { %v1913_v0 = vsel %vm1803_vm2, %v1905_v33, %v2904_v45 }
0x190e   :  { %1922 = vst.msk [vmem:[%s3034_s10 + $0x28] sm:$0xff] %vm1916_vm3, %v1913_v0  ;;  %v1893_v4 = vpop.permute.xlu1 %1892 }
0x190f   :  { %v1906_v30 = vmul.f32 %v1893_v4, %v2930_v15 }
0x1911   :  { %v1914_v54 = vsel %vm1803_vm2, %v1906_v30, %v2930_v15 }
0x1912   :  { %1923 = vst.msk [vmem:[%s3034_s10 + $0x30] sm:$0xff] %vm1916_vm3, %v1914_v54  ;;  %v1878_v16 = vpop.permute.xlu1 %1877 }
0x1913   :  { %v1903_v52 = vmul.f32 %v1878_v16, %v2922_v43 }
0x1915   :  { %v1911_v45 = vsel %vm1803_vm2, %v1903_v52, %v2922_v43 }
0x1916   :  { %1920 = vst.msk [vmem:[%s3034_s10 + $0x18] sm:$0xff] %vm1916_vm3, %v1911_v45  ;;  %v1873_v24 = vpop.permute.xlu1 %1872 }
0x1917   :  { %v1902_v18 = vmul.f32 %v1873_v24, %v2925_v11 }
0x1919   :  { %v1910_v15 = vsel %vm1803_vm2, %v1902_v18, %v2925_v11 }
0x191a   :  { %1919 = vst.msk [vmem:[%s3034_s10 + $0x10] sm:$0xff] %vm1916_vm3, %v1910_v15  ;;  %v1898_v9 = vpop.permute.xlu1 %1897 }
0x191b   :  { %v1907_v1 = vmul.f32 %v1898_v9, %v2927_v12 }
0x191d   :  { %v1915_v43 = vsel %vm1803_vm2, %v1907_v1, %v2927_v12 }
0x191e   :  { %1924 = vst.msk [vmem:[%s3034_s10 + $0x38] sm:$0xff] %vm1916_vm3, %v1915_v43 }

</bundles_post_ra>
